<compile_context>
chip_gen: v6e
topology: v6e:2x2x1
jax: 0.10.0
libtpu: 0.0.40
codegen_flags: <defaults>
</compile_context>

<pallas_src>
import functools

import jax
import jax.numpy as jnp
import numpy as np
from jax import lax
from jax.experimental import pallas as pl
from jax.experimental.pallas import tpu as pltpu


def _downsample_kernel(x_ref, w1_ref, s1_ref, b1_ref, w2_ref, s2_ref, b2_ref,
                       o_ref, pad1_ref, pad2_ref, *, Ho, Wo, Cin, Cmid, RH):
    n_chunks = Ho // RH

    # ---- zero only the 1-pixel borders of the padded scratches -------------
    # (interior is fully overwritten every grid step; border strips are cheap
    #  and stay correct regardless of how the grid is split across cores)
    def zero_border(pad_ref, C):
        zrow = jnp.zeros((1, Wo + 2, C), jnp.float32)
        pad_ref[pl.ds(0, 1), :, :] = zrow
        pad_ref[pl.ds(Ho + 1, 1), :, :] = zrow
        zcol = jnp.zeros((Ho + 2, 1, C), jnp.float32)
        pad_ref[:, pl.ds(0, 1), :] = zcol
        pad_ref[:, pl.ds(Wo + 1, 1), :] = zcol

    zero_border(pad1_ref, Cin)
    zero_border(pad2_ref, Cmid)

    # ---- MaxPool2d(2) (f32) --------------------------------------------------
    # x_ref[ho, i, wo, j*Cin + c] == x_nhwc[2*ho + i, 2*wo + j, c]
    x = x_ref[...]
    hmax = jnp.maximum(x[:, 0], x[:, 1])                        # (Ho, Wo, 2*Cin)
    pooled = jnp.maximum(hmax[:, :, :Cin], hmax[:, :, Cin:])    # (Ho, Wo, Cin)
    pad1_ref[pl.ds(1, Ho), pl.ds(1, Wo), :] = pooled

    def conv_chunk(r, pad_ref, cin, w_ref, s_ref, b_ref):
        # 3x3 conv on RH output rows: im2col -> ONE MXU matmul per chunk
        # (bf16 x bf16 operands, f32 accumulation), then folded conv-bias +
        # eval-mode BN + ReLU in f32.
        row0 = pl.multiple_of(r * RH, RH)
        taps = [pad_ref[pl.ds(row0 + ky, RH), pl.ds(kx, Wo), :]
                for ky in range(3) for kx in range(3)]
        patch = jnp.concatenate(taps, axis=-1).reshape(RH * Wo, 9 * cin)
        acc = jnp.dot(patch.astype(jnp.bfloat16), w_ref[...],
                      preferred_element_type=jnp.float32)
        return jnp.maximum(acc * s_ref[...] + b_ref[...], 0.0), row0

    # ---- conv1 + BN + ReLU: chunk output goes straight into pad2's interior --
    def body1(r, carry):
        h1, row0 = conv_chunk(r, pad1_ref, Cin, w1_ref, s1_ref, b1_ref)
        pad2_ref[pl.ds(row0 + 1, RH), pl.ds(1, Wo), :] = h1.reshape(RH, Wo, Cmid)
        return carry

    lax.fori_loop(0, n_chunks, body1, 0)

    # ---- conv2 + BN + ReLU -> output -----------------------------------------
    def body2(r, carry):
        h2, _ = conv_chunk(r, pad2_ref, Cmid, w2_ref, s2_ref, b2_ref)
        m0 = pl.multiple_of(r * (RH * Wo), RH * Wo)
        o_ref[pl.ds(m0, RH * Wo), :] = h2.astype(o_ref.dtype)
        return carry

    lax.fori_loop(0, n_chunks, body2, 0)


def _round_up(x, m):
    return ((x + m - 1) // m) * m


def _pick_row_chunk(Ho, Wo, cmax):
    """Largest divisor RH of Ho whose per-chunk bf16 im2col patch stays small."""
    budget = 2 << 20          # ~2 MiB patch per conv chunk
    max_rows = 512            # keep the MXU matmul M-dim modest
    best = 1
    for rh in range(1, Ho + 1):
        if Ho % rh:
            continue
        rows = rh * Wo
        if rh > 1 and rows > max_rows:
            continue
        if rows * 9 * cmax * 2 <= budget:
            best = rh
    return best


def _vmem_limit_bytes(Ho, Wo, Cin, Cmid_p, Cout_p, RH):
    f32, bf16 = 4, 2
    est = 0
    est += 2 * (Ho * 2 * Wo * 2 * Cin) * f32                 # input block (x2 buf)
    est += 2 * (Ho * Wo * Cout_p) * f32                       # output block (x2 buf)
    est += (9 * Cin * Cmid_p + 9 * Cmid_p * Cout_p) * bf16    # weights (Buffered(1))
    est += 4 * max(Cmid_p, Cout_p) * f32                      # scale / bias rows
    est += (Ho + 2) * (Wo + 2) * (Cin + Cmid_p) * f32         # pad scratches
    est += RH * Wo * 9 * max(Cin, Cmid_p) * bf16              # im2col patch (1 chunk)
    est += RH * Wo * max(Cmid_p, Cout_p) * f32                # matmul accumulator
    phys = 64 << 20                                           # conservative (v7x)
    try:
        phys = pltpu.get_tpu_info().vmem_capacity_bytes
    except Exception:
        pass
    want = max(32 << 20, 2 * est + (8 << 20))
    return int(min(want, phys - (8 << 20)))


def downsample_forward(x_nchw, p, eps=1e-5, max_chunk_rows=None):
    N, Cin, H, W = x_nchw.shape
    assert H % 2 == 0 and W % 2 == 0, "MaxPool2d(2) path requires even H and W"
    Ho, Wo = H // 2, W // 2
    Cmid = p["w1"].shape[-1]
    Cout = p["w2"].shape[-1]

    # Lane-dense channel padding only when the channel count is large enough
    # for the extra HBM traffic to be cheap; at small C the kernel is
    # HBM-bound and padding to 128 would inflate the writeback ~16x.
    Cmid_p = _round_up(Cmid, 128) if Cmid >= 64 else Cmid
    Cout_p = _round_up(Cout, 128) if Cout >= 64 else Cout

    RH = _pick_row_chunk(Ho, Wo, max(Cin, Cmid_p))
    if max_chunk_rows is not None:
        RH = max(d for d in range(1, max_chunk_rows + 1) if Ho % d == 0)

    # NCHW -> NHWC (glue transpose), then a FREE contiguous reshape exposing
    # the 2x2 pooling windows (no extra HBM rearrangement pass).
    x = jnp.transpose(x_nchw, (0, 2, 3, 1)).astype(jnp.float32)   # (N, H, W, Cin)
    xp = x.reshape(N, Ho, 2, Wo, 2 * Cin)

    # im2col weights (3,3,Ci,Co) -> (9*Ci, Co); zero-pad to the kernel-visible
    # channel counts; bf16 MXU operands.
    w1 = p["w1"].astype(jnp.float32).reshape(9 * Cin, Cmid)
    w1 = jnp.pad(w1, ((0, 0), (0, Cmid_p - Cmid))).astype(jnp.bfloat16)
    w2 = jnp.pad(p["w2"].astype(jnp.float32),
                 ((0, 0), (0, 0), (0, Cmid_p - Cmid), (0, 0)))
    w2 = w2.reshape(9 * Cmid_p, Cout)
    w2 = jnp.pad(w2, ((0, 0), (0, Cout_p - Cout))).astype(jnp.bfloat16)

    # fold conv bias + eval-mode BatchNorm into per-channel scale / bias (f32)
    s1 = p["g1"] / jnp.sqrt(p["v1"] + eps)
    b1 = (p["bc1"] - p["m1"]) * s1 + p["beta1"]
    s2 = p["g2"] / jnp.sqrt(p["v2"] + eps)
    b2 = (p["bc2"] - p["m2"]) * s2 + p["beta2"]
    s1 = jnp.pad(s1.reshape(1, Cmid).astype(jnp.float32), ((0, 0), (0, Cmid_p - Cmid)))
    b1 = jnp.pad(b1.reshape(1, Cmid).astype(jnp.float32), ((0, 0), (0, Cmid_p - Cmid)))
    s2 = jnp.pad(s2.reshape(1, Cout).astype(jnp.float32), ((0, 0), (0, Cout_p - Cout)))
    b2 = jnp.pad(b2.reshape(1, Cout).astype(jnp.float32), ((0, 0), (0, Cout_p - Cout)))

    kernel = functools.partial(_downsample_kernel, Ho=Ho, Wo=Wo, Cin=Cin,
                               Cmid=Cmid_p, RH=RH)

    # grid-invariant blocks: single-buffered (double-buffering them wastes VMEM)
    def const_spec(shape):
        return pl.BlockSpec(shape, lambda b: (0, 0), pipeline_mode=pl.Buffered(1))

    out_flat = pl.pallas_call(
        kernel,
        out_shape=jax.ShapeDtypeStruct((N, Ho * Wo, Cout_p), jnp.float32),
        grid_spec=pltpu.PrefetchScalarGridSpec(
            num_scalar_prefetch=0,
            grid=(N,),
            in_specs=[
                pl.BlockSpec((None, Ho, 2, Wo, 2 * Cin),
                             lambda b: (b, 0, 0, 0, 0)),
                const_spec((9 * Cin, Cmid_p)),
                const_spec((1, Cmid_p)),
                const_spec((1, Cmid_p)),
                const_spec((9 * Cmid_p, Cout_p)),
                const_spec((1, Cout_p)),
                const_spec((1, Cout_p)),
            ],
            out_specs=pl.BlockSpec((None, Ho * Wo, Cout_p), lambda b: (b, 0, 0)),
            scratch_shapes=[
                pltpu.VMEM((Ho + 2, Wo + 2, Cin), jnp.float32),     # conv1 padding
                pltpu.VMEM((Ho + 2, Wo + 2, Cmid_p), jnp.float32),  # conv2 padding
            ],
        ),
        compiler_params=pltpu.CompilerParams(
            dimension_semantics=("parallel",),
            vmem_limit_bytes=_vmem_limit_bytes(Ho, Wo, Cin, Cmid_p, Cout_p, RH),
        ),
    )(xp, w1, s1, b1, w2, s2, b2)

    # drop any lane padding, restore NHWC, then NCHW to match PyTorch.
    out_nhwc = out_flat[:, :, :Cout].reshape(N, Ho, Wo, Cout)
    return jnp.transpose(out_nhwc, (0, 3, 1, 2))


def reference_forward(x_nchw, p, eps=1e-5):
    """Pure-JAX reference.  Conv operands are cast to bf16 with f32 accumulation
    to match the kernel's MXU precision; pooling / BN / ReLU stay f32."""
    x = jnp.transpose(x_nchw, (0, 2, 3, 1)).astype(jnp.float32)
    N, H, W, Cin = x.shape
    xpool = x.reshape(N, H // 2, 2, W // 2, 2, Cin).max(axis=(2, 4))

    def conv_bn_relu(h, w, bc, g, beta, m, v):
        y = lax.conv_general_dilated(
            h.astype(jnp.bfloat16), w.astype(jnp.bfloat16), (1, 1), "SAME",
            dimension_numbers=("NHWC", "HWIO", "NHWC"),
            preferred_element_type=jnp.float32) + bc
        y = (y - m) / jnp.sqrt(v + eps) * g + beta
        return jnp.maximum(y, 0.0)

    h1 = conv_bn_relu(xpool, p["w1"], p["bc1"], p["g1"], p["beta1"], p["m1"], p["v1"])
    h2 = conv_bn_relu(h1, p["w2"], p["bc2"], p["g2"], p["beta2"], p["m2"], p["v2"])
    return jnp.transpose(h2, (0, 3, 1, 2))


if __name__ == "__main__":
    key = jax.random.PRNGKey(0)
    ks = jax.random.split(key, 13)

    N, Cin, H, W = 2, 4, 16, 16          # small NCHW input
    Cout = 8
    Cmid = Cout                           # DoubleConvolutionBlock default mid_channels

    x = jax.random.normal(ks[0], (N, Cin, H, W), jnp.float32)

    params = dict(
        # conv1: 3x3, Cin -> Cmid (HWIO) + bias; BN1 (gamma, beta, running mean/var)
        w1=jax.random.normal(ks[1], (3, 3, Cin, Cmid), jnp.float32) * 0.2,
        bc1=jax.random.normal(ks[2], (Cmid,), jnp.float32) * 0.1,
        g1=jax.random.uniform(ks[3], (Cmid,), jnp.float32, 0.5, 1.5),
        beta1=jax.random.normal(ks[4], (Cmid,), jnp.float32) * 0.1,
        m1=jax.random.normal(ks[5], (Cmid,), jnp.float32) * 0.1,
        v1=jax.random.uniform(ks[6], (Cmid,), jnp.float32, 0.5, 1.5),
        # conv2: 3x3, Cmid -> Cout + bias; BN2
        w2=jax.random.normal(ks[7], (3, 3, Cmid, Cout), jnp.float32) * 0.2,
        bc2=jax.random.normal(ks[8], (Cout,), jnp.float32) * 0.1,
        g2=jax.random.uniform(ks[9], (Cout,), jnp.float32, 0.5, 1.5),
        beta2=jax.random.normal(ks[10], (Cout,), jnp.float32) * 0.1,
        m2=jax.random.normal(ks[11], (Cout,), jnp.float32) * 0.1,
        v2=jax.random.uniform(ks[12], (Cout,), jnp.float32, 0.5, 1.5),
    )

    ref = jax.block_until_ready(reference_forward(x, params))

    # single-chunk path (whole image fits one im2col chunk)
    out = jax.block_until_ready(downsample_forward(x, params))
    assert out.shape == (N, Cout, H // 2, W // 2), out.shape
    np.testing.assert_allclose(np.asarray(out), np.asarray(ref),
                               rtol=1e-3, atol=1e-3)

    # chunked path (force 2-row chunks -> 4 chunks) to exercise the bounded
    # im2col row-tiling loop.
    out_c = jax.block_until_ready(downsample_forward(x, params, max_chunk_rows=2))
    np.testing.assert_allclose(np.asarray(out_c), np.asarray(ref),
                               rtol=1e-3, atol=1e-3)

    print("KERNEL_OK")
</pallas_src>

<mosaic_0001>
module attributes {stable_mosaic.version = 11 : i64} {
  func.func @_downsample_kernel(%arg0: i32, %arg1: memref<1x8x2x8x8xf32, #tpu.memory_space<vmem>>, %arg2: memref<36x8xbf16, #tpu.memory_space<vmem>>, %arg3: memref<1x8xf32, #tpu.memory_space<vmem>>, %arg4: memref<1x8xf32, #tpu.memory_space<vmem>>, %arg5: memref<72x8xbf16, #tpu.memory_space<vmem>>, %arg6: memref<1x8xf32, #tpu.memory_space<vmem>>, %arg7: memref<1x8xf32, #tpu.memory_space<vmem>>, %arg8: memref<1x64x8xf32, #tpu.memory_space<vmem>>, %arg9: memref<10x10x4xf32, #tpu.memory_space<vmem>>, %arg10: memref<10x10x8xf32, #tpu.memory_space<vmem>>) attributes {dimension_semantics = [#tpu.dimension_semantics<parallel>], iteration_bounds = array<i64: 2>, scalar_prefetch = 0 : i64, scratch_operands = 2 : i64, tpu.core_type = #tpu.core_type<tc>, window_params = [{transform_indices = @transform_0, window_bounds = array<i64: 1, 8, 2, 8, 8>}, {pipeline_mode = #tpu.pipeline_mode<synchronous>, transform_indices = @transform_1, window_bounds = array<i64: 36, 8>}, {pipeline_mode = #tpu.pipeline_mode<synchronous>, transform_indices = @transform_2, window_bounds = array<i64: 1, 8>}, {pipeline_mode = #tpu.pipeline_mode<synchronous>, transform_indices = @transform_3, window_bounds = array<i64: 1, 8>}, {pipeline_mode = #tpu.pipeline_mode<synchronous>, transform_indices = @transform_4, window_bounds = array<i64: 72, 8>}, {pipeline_mode = #tpu.pipeline_mode<synchronous>, transform_indices = @transform_5, window_bounds = array<i64: 1, 8>}, {pipeline_mode = #tpu.pipeline_mode<synchronous>, transform_indices = @transform_6, window_bounds = array<i64: 1, 8>}, {transform_indices = @transform_7, window_bounds = array<i64: 1, 64, 8>}]} {
    %cst = arith.constant 0.000000e+00 : f32
    %0 = vector.broadcast %cst : f32 to vector<1x10x4xf32>
    %c0 = arith.constant 0 : index
    %c0_0 = arith.constant 0 : index
    %c0_1 = arith.constant 0 : index
    %1 = vector.load %arg9[%c0, %c0_0, %c0_1] : memref<10x10x4xf32, #tpu.memory_space<vmem>>, vector<1x10x4xf32>
    tpu.vector_store %arg9[%c0, %c0_0, %c0_1], %0 {strides = array<i32>} : memref<10x10x4xf32, #tpu.memory_space<vmem>>, vector<1x10x4xf32>,
    %c9 = arith.constant 9 : index
    %c0_2 = arith.constant 0 : index
    %c0_3 = arith.constant 0 : index
    %2 = vector.load %arg9[%c9, %c0_2, %c0_3] : memref<10x10x4xf32, #tpu.memory_space<vmem>>, vector<1x10x4xf32>
    tpu.vector_store %arg9[%c9, %c0_2, %c0_3], %0 {strides = array<i32>} : memref<10x10x4xf32, #tpu.memory_space<vmem>>, vector<1x10x4xf32>,
    %cst_4 = arith.constant 0.000000e+00 : f32
    %3 = vector.broadcast %cst_4 : f32 to vector<10x1x4xf32>
    %c0_5 = arith.constant 0 : index
    %c0_6 = arith.constant 0 : index
    %c0_7 = arith.constant 0 : index
    %4 = vector.load %arg9[%c0_5, %c0_6, %c0_7] : memref<10x10x4xf32, #tpu.memory_space<vmem>>, vector<10x1x4xf32>
    tpu.vector_store %arg9[%c0_5, %c0_6, %c0_7], %3 {strides = array<i32>} : memref<10x10x4xf32, #tpu.memory_space<vmem>>, vector<10x1x4xf32>,
    %c0_8 = arith.constant 0 : index
    %c9_9 = arith.constant 9 : index
    %c0_10 = arith.constant 0 : index
    %5 = vector.load %arg9[%c0_8, %c9_9, %c0_10] : memref<10x10x4xf32, #tpu.memory_space<vmem>>, vector<10x1x4xf32>
    tpu.vector_store %arg9[%c0_8, %c9_9, %c0_10], %3 {strides = array<i32>} : memref<10x10x4xf32, #tpu.memory_space<vmem>>, vector<10x1x4xf32>,
    %cst_11 = arith.constant 0.000000e+00 : f32
    %6 = vector.broadcast %cst_11 : f32 to vector<1x10x8xf32>
    %c0_12 = arith.constant 0 : index
    %c0_13 = arith.constant 0 : index
    %c0_14 = arith.constant 0 : index
    %7 = vector.load %arg10[%c0_12, %c0_13, %c0_14] : memref<10x10x8xf32, #tpu.memory_space<vmem>>, vector<1x10x8xf32>
    tpu.vector_store %arg10[%c0_12, %c0_13, %c0_14], %6 {strides = array<i32>} : memref<10x10x8xf32, #tpu.memory_space<vmem>>, vector<1x10x8xf32>,
    %c9_15 = arith.constant 9 : index
    %c0_16 = arith.constant 0 : index
    %c0_17 = arith.constant 0 : index
    %8 = vector.load %arg10[%c9_15, %c0_16, %c0_17] : memref<10x10x8xf32, #tpu.memory_space<vmem>>, vector<1x10x8xf32>
    tpu.vector_store %arg10[%c9_15, %c0_16, %c0_17], %6 {strides = array<i32>} : memref<10x10x8xf32, #tpu.memory_space<vmem>>, vector<1x10x8xf32>,
    %cst_18 = arith.constant 0.000000e+00 : f32
    %9 = vector.broadcast %cst_18 : f32 to vector<10x1x8xf32>
    %c0_19 = arith.constant 0 : index
    %c0_20 = arith.constant 0 : index
    %c0_21 = arith.constant 0 : index
    %10 = vector.load %arg10[%c0_19, %c0_20, %c0_21] : memref<10x10x8xf32, #tpu.memory_space<vmem>>, vector<10x1x8xf32>
    tpu.vector_store %arg10[%c0_19, %c0_20, %c0_21], %9 {strides = array<i32>} : memref<10x10x8xf32, #tpu.memory_space<vmem>>, vector<10x1x8xf32>,
    %c0_22 = arith.constant 0 : index
    %c9_23 = arith.constant 9 : index
    %c0_24 = arith.constant 0 : index
    %11 = vector.load %arg10[%c0_22, %c9_23, %c0_24] : memref<10x10x8xf32, #tpu.memory_space<vmem>>, vector<10x1x8xf32>
    tpu.vector_store %arg10[%c0_22, %c9_23, %c0_24], %9 {strides = array<i32>} : memref<10x10x8xf32, #tpu.memory_space<vmem>>, vector<10x1x8xf32>,
    %c0_25 = arith.constant 0 : index
    %c0_26 = arith.constant 0 : index
    %c0_27 = arith.constant 0 : index
    %c0_28 = arith.constant 0 : index
    %c0_29 = arith.constant 0 : index
    %12 = vector.load %arg1[%c0_25, %c0_26, %c0_27, %c0_28, %c0_29] : memref<1x8x2x8x8xf32, #tpu.memory_space<vmem>>, vector<1x8x2x8x8xf32>
    %13 = vector.shape_cast %12 : vector<1x8x2x8x8xf32> to vector<8x2x8x8xf32>
    %14 = vector.extract_strided_slice %13 {offsets = [0, 0, 0, 0], sizes = [8, 1, 8, 8], strides = [1, 1, 1, 1]} : vector<8x2x8x8xf32> to vector<8x1x8x8xf32>
    %15 = vector.shape_cast %14 : vector<8x1x8x8xf32> to vector<8x8x8xf32>
    %16 = vector.extract_strided_slice %13 {offsets = [0, 1, 0, 0], sizes = [8, 1, 8, 8], strides = [1, 1, 1, 1]} : vector<8x2x8x8xf32> to vector<8x1x8x8xf32>
    %17 = vector.shape_cast %16 : vector<8x1x8x8xf32> to vector<8x8x8xf32>
    %18 = arith.maximumf %15, %17 : vector<8x8x8xf32>
    %19 = vector.extract_strided_slice %18 {offsets = [0, 0, 0], sizes = [8, 8, 4], strides = [1, 1, 1]} : vector<8x8x8xf32> to vector<8x8x4xf32>
    %20 = vector.extract_strided_slice %18 {offsets = [0, 0, 4], sizes = [8, 8, 4], strides = [1, 1, 1]} : vector<8x8x8xf32> to vector<8x8x4xf32>
    %21 = arith.maximumf %19, %20 : vector<8x8x4xf32>
    %c1 = arith.constant 1 : index
    %c1_30 = arith.constant 1 : index
    %c0_31 = arith.constant 0 : index
    %22 = vector.load %arg9[%c1, %c1_30, %c0_31] : memref<10x10x4xf32, #tpu.memory_space<vmem>>, vector<8x8x4xf32>
    tpu.vector_store %arg9[%c1, %c1_30, %c0_31], %21 {strides = array<i32>} : memref<10x10x4xf32, #tpu.memory_space<vmem>>, vector<8x8x4xf32>,
    %c0_i32 = arith.constant 0 : i32
    %c8_i32 = arith.constant 8 : i32
    %23 = arith.muli %c0_i32, %c8_i32 : i32
    %24 = tpu.assume_multiple %23, 8 : i32
    %c0_i32_32 = arith.constant 0 : i32
    %25 = arith.addi %24, %c0_i32_32 : i32
    %26 = arith.index_cast %25 : i32 to index
    %c0_33 = arith.constant 0 : index
    %c0_34 = arith.constant 0 : index
    %27 = vector.load %arg9[%26, %c0_33, %c0_34] : memref<10x10x4xf32, #tpu.memory_space<vmem>>, vector<8x8x4xf32>
    %c0_i32_35 = arith.constant 0 : i32
    %28 = arith.addi %24, %c0_i32_35 : i32
    %29 = arith.index_cast %28 : i32 to index
    %c1_36 = arith.constant 1 : index
    %c0_37 = arith.constant 0 : index
    %30 = vector.load %arg9[%29, %c1_36, %c0_37] : memref<10x10x4xf32, #tpu.memory_space<vmem>>, vector<8x8x4xf32>
    %c0_i32_38 = arith.constant 0 : i32
    %31 = arith.addi %24, %c0_i32_38 : i32
    %32 = arith.index_cast %31 : i32 to index
    %c2 = arith.constant 2 : index
    %c0_39 = arith.constant 0 : index
    %33 = vector.load %arg9[%32, %c2, %c0_39] : memref<10x10x4xf32, #tpu.memory_space<vmem>>, vector<8x8x4xf32>
    %c1_i32 = arith.constant 1 : i32
    %34 = arith.addi %24, %c1_i32 : i32
    %35 = arith.index_cast %34 : i32 to index
    %c0_40 = arith.constant 0 : index
    %c0_41 = arith.constant 0 : index
    %36 = vector.load %arg9[%35, %c0_40, %c0_41] : memref<10x10x4xf32, #tpu.memory_space<vmem>>, vector<8x8x4xf32>
    %c1_i32_42 = arith.constant 1 : i32
    %37 = arith.addi %24, %c1_i32_42 : i32
    %38 = arith.index_cast %37 : i32 to index
    %c1_43 = arith.constant 1 : index
    %c0_44 = arith.constant 0 : index
    %39 = vector.load %arg9[%38, %c1_43, %c0_44] : memref<10x10x4xf32, #tpu.memory_space<vmem>>, vector<8x8x4xf32>
    %c1_i32_45 = arith.constant 1 : i32
    %40 = arith.addi %24, %c1_i32_45 : i32
    %41 = arith.index_cast %40 : i32 to index
    %c2_46 = arith.constant 2 : index
    %c0_47 = arith.constant 0 : index
    %42 = vector.load %arg9[%41, %c2_46, %c0_47] : memref<10x10x4xf32, #tpu.memory_space<vmem>>, vector<8x8x4xf32>
    %c2_i32 = arith.constant 2 : i32
    %43 = arith.addi %24, %c2_i32 : i32
    %44 = arith.index_cast %43 : i32 to index
    %c0_48 = arith.constant 0 : index
    %c0_49 = arith.constant 0 : index
    %45 = vector.load %arg9[%44, %c0_48, %c0_49] : memref<10x10x4xf32, #tpu.memory_space<vmem>>, vector<8x8x4xf32>
    %c2_i32_50 = arith.constant 2 : i32
    %46 = arith.addi %24, %c2_i32_50 : i32
    %47 = arith.index_cast %46 : i32 to index
    %c1_51 = arith.constant 1 : index
    %c0_52 = arith.constant 0 : index
    %48 = vector.load %arg9[%47, %c1_51, %c0_52] : memref<10x10x4xf32, #tpu.memory_space<vmem>>, vector<8x8x4xf32>
    %c2_i32_53 = arith.constant 2 : i32
    %49 = arith.addi %24, %c2_i32_53 : i32
    %50 = arith.index_cast %49 : i32 to index
    %c2_54 = arith.constant 2 : index
    %c0_55 = arith.constant 0 : index
    %51 = vector.load %arg9[%50, %c2_54, %c0_55] : memref<10x10x4xf32, #tpu.memory_space<vmem>>, vector<8x8x4xf32>
    %52 = tpu.concatenate %27, %30, %33, %36, %39, %42, %45, %48, %51 in 2 : vector<8x8x4xf32>, vector<8x8x4xf32>, vector<8x8x4xf32>, vector<8x8x4xf32>, vector<8x8x4xf32>, vector<8x8x4xf32>, vector<8x8x4xf32>, vector<8x8x4xf32>, vector<8x8x4xf32> -> vector<8x8x36xf32>
    %53 = vector.shape_cast %52 : vector<8x8x36xf32> to vector<64x36xf32>
    %54 = arith.truncf %53 : vector<64x36xf32> to vector<64x36xbf16>
    %c0_56 = arith.constant 0 : index
    %c0_57 = arith.constant 0 : index
    %55 = vector.load %arg2[%c0_56, %c0_57] : memref<36x8xbf16, #tpu.memory_space<vmem>>, vector<36x8xbf16>
    %cst_58 = arith.constant dense<0.000000e+00> : vector<64x8xf32>
    %56 = tpu.matmul %54, %55, %cst_58 {dimension_numbers = #tpu.dot_dimension_numbers<[1], [0], [0], [1], [0, 0, 1, 1], [], []>} : vector<64x36xbf16>, vector<36x8xbf16>, vector<64x8xf32> -> vector<64x8xf32>
    %c0_59 = arith.constant 0 : index
    %c0_60 = arith.constant 0 : index
    %57 = vector.load %arg3[%c0_59, %c0_60] : memref<1x8xf32, #tpu.memory_space<vmem>>, vector<1x8xf32>
    %58 = vector.broadcast %57 : vector<1x8xf32> to vector<64x8xf32>
    %59 = arith.mulf %56, %58 : vector<64x8xf32>
    %c0_61 = arith.constant 0 : index
    %c0_62 = arith.constant 0 : index
    %60 = vector.load %arg4[%c0_61, %c0_62] : memref<1x8xf32, #tpu.memory_space<vmem>>, vector<1x8xf32>
    %61 = vector.broadcast %60 : vector<1x8xf32> to vector<64x8xf32>
    %62 = arith.addf %59, %61 : vector<64x8xf32>
    %cst_63 = arith.constant 0.000000e+00 : f32
    %63 = vector.broadcast %cst_63 : f32 to vector<64x8xf32>
    %64 = arith.maximumf %62, %63 : vector<64x8xf32>
    %65 = vector.shape_cast %64 : vector<64x8xf32> to vector<8x8x8xf32>
    %c1_i32_64 = arith.constant 1 : i32
    %66 = arith.addi %24, %c1_i32_64 : i32
    %67 = arith.index_cast %66 : i32 to index
    %c1_65 = arith.constant 1 : index
    %c0_66 = arith.constant 0 : index
    %68 = vector.load %arg10[%67, %c1_65, %c0_66] : memref<10x10x8xf32, #tpu.memory_space<vmem>>, vector<8x8x8xf32>
    tpu.vector_store %arg10[%67, %c1_65, %c0_66], %65 {strides = array<i32>} : memref<10x10x8xf32, #tpu.memory_space<vmem>>, vector<8x8x8xf32>,
    %c1_i32_67 = arith.constant 1 : i32
    %c0_i32_68 = arith.constant 0 : i32
    %c8_i32_69 = arith.constant 8 : i32
    %69 = arith.muli %c0_i32_68, %c8_i32_69 : i32
    %70 = tpu.assume_multiple %69, 8 : i32
    %c0_i32_70 = arith.constant 0 : i32
    %71 = arith.addi %70, %c0_i32_70 : i32
    %72 = arith.index_cast %71 : i32 to index
    %c0_71 = arith.constant 0 : index
    %c0_72 = arith.constant 0 : index
    %73 = vector.load %arg10[%72, %c0_71, %c0_72] : memref<10x10x8xf32, #tpu.memory_space<vmem>>, vector<8x8x8xf32>
    %c0_i32_73 = arith.constant 0 : i32
    %74 = arith.addi %70, %c0_i32_73 : i32
    %75 = arith.index_cast %74 : i32 to index
    %c1_74 = arith.constant 1 : index
    %c0_75 = arith.constant 0 : index
    %76 = vector.load %arg10[%75, %c1_74, %c0_75] : memref<10x10x8xf32, #tpu.memory_space<vmem>>, vector<8x8x8xf32>
    %c0_i32_76 = arith.constant 0 : i32
    %77 = arith.addi %70, %c0_i32_76 : i32
    %78 = arith.index_cast %77 : i32 to index
    %c2_77 = arith.constant 2 : index
    %c0_78 = arith.constant 0 : index
    %79 = vector.load %arg10[%78, %c2_77, %c0_78] : memref<10x10x8xf32, #tpu.memory_space<vmem>>, vector<8x8x8xf32>
    %c1_i32_79 = arith.constant 1 : i32
    %80 = arith.addi %70, %c1_i32_79 : i32
    %81 = arith.index_cast %80 : i32 to index
    %c0_80 = arith.constant 0 : index
    %c0_81 = arith.constant 0 : index
    %82 = vector.load %arg10[%81, %c0_80, %c0_81] : memref<10x10x8xf32, #tpu.memory_space<vmem>>, vector<8x8x8xf32>
    %c1_i32_82 = arith.constant 1 : i32
    %83 = arith.addi %70, %c1_i32_82 : i32
    %84 = arith.index_cast %83 : i32 to index
    %c1_83 = arith.constant 1 : index
    %c0_84 = arith.constant 0 : index
    %85 = vector.load %arg10[%84, %c1_83, %c0_84] : memref<10x10x8xf32, #tpu.memory_space<vmem>>, vector<8x8x8xf32>
    %c1_i32_85 = arith.constant 1 : i32
    %86 = arith.addi %70, %c1_i32_85 : i32
    %87 = arith.index_cast %86 : i32 to index
    %c2_86 = arith.constant 2 : index
    %c0_87 = arith.constant 0 : index
    %88 = vector.load %arg10[%87, %c2_86, %c0_87] : memref<10x10x8xf32, #tpu.memory_space<vmem>>, vector<8x8x8xf32>
    %c2_i32_88 = arith.constant 2 : i32
    %89 = arith.addi %70, %c2_i32_88 : i32
    %90 = arith.index_cast %89 : i32 to index
    %c0_89 = arith.constant 0 : index
    %c0_90 = arith.constant 0 : index
    %91 = vector.load %arg10[%90, %c0_89, %c0_90] : memref<10x10x8xf32, #tpu.memory_space<vmem>>, vector<8x8x8xf32>
    %c2_i32_91 = arith.constant 2 : i32
    %92 = arith.addi %70, %c2_i32_91 : i32
    %93 = arith.index_cast %92 : i32 to index
    %c1_92 = arith.constant 1 : index
    %c0_93 = arith.constant 0 : index
    %94 = vector.load %arg10[%93, %c1_92, %c0_93] : memref<10x10x8xf32, #tpu.memory_space<vmem>>, vector<8x8x8xf32>
    %c2_i32_94 = arith.constant 2 : i32
    %95 = arith.addi %70, %c2_i32_94 : i32
    %96 = arith.index_cast %95 : i32 to index
    %c2_95 = arith.constant 2 : index
    %c0_96 = arith.constant 0 : index
    %97 = vector.load %arg10[%96, %c2_95, %c0_96] : memref<10x10x8xf32, #tpu.memory_space<vmem>>, vector<8x8x8xf32>
    %98 = tpu.concatenate %73, %76, %79, %82, %85, %88, %91, %94, %97 in 2 : vector<8x8x8xf32>, vector<8x8x8xf32>, vector<8x8x8xf32>, vector<8x8x8xf32>, vector<8x8x8xf32>, vector<8x8x8xf32>, vector<8x8x8xf32>, vector<8x8x8xf32>, vector<8x8x8xf32> -> vector<8x8x72xf32>
    %99 = vector.shape_cast %98 : vector<8x8x72xf32> to vector<64x72xf32>
    %100 = arith.truncf %99 : vector<64x72xf32> to vector<64x72xbf16>
    %c0_97 = arith.constant 0 : index
    %c0_98 = arith.constant 0 : index
    %101 = vector.load %arg5[%c0_97, %c0_98] : memref<72x8xbf16, #tpu.memory_space<vmem>>, vector<72x8xbf16>
    %cst_99 = arith.constant dense<0.000000e+00> : vector<64x8xf32>
    %102 = tpu.matmul %100, %101, %cst_99 {dimension_numbers = #tpu.dot_dimension_numbers<[1], [0], [0], [1], [0, 0, 1, 1], [], []>} : vector<64x72xbf16>, vector<72x8xbf16>, vector<64x8xf32> -> vector<64x8xf32>
    %c0_100 = arith.constant 0 : index
    %c0_101 = arith.constant 0 : index
    %103 = vector.load %arg6[%c0_100, %c0_101] : memref<1x8xf32, #tpu.memory_space<vmem>>, vector<1x8xf32>
    %104 = vector.broadcast %103 : vector<1x8xf32> to vector<64x8xf32>
    %105 = arith.mulf %102, %104 : vector<64x8xf32>
    %c0_102 = arith.constant 0 : index
    %c0_103 = arith.constant 0 : index
    %106 = vector.load %arg7[%c0_102, %c0_103] : memref<1x8xf32, #tpu.memory_space<vmem>>, vector<1x8xf32>
    %107 = vector.broadcast %106 : vector<1x8xf32> to vector<64x8xf32>
    %108 = arith.addf %105, %107 : vector<64x8xf32>
    %cst_104 = arith.constant 0.000000e+00 : f32
    %109 = vector.broadcast %cst_104 : f32 to vector<64x8xf32>
    %110 = arith.maximumf %108, %109 : vector<64x8xf32>
    %c64_i32 = arith.constant 64 : i32
    %111 = arith.muli %c0_i32_68, %c64_i32 : i32
    %112 = tpu.assume_multiple %111, 64 : i32
    %c0_105 = arith.constant 0 : index
    %113 = arith.index_cast %112 : i32 to index
    %c0_106 = arith.constant 0 : index
    %114 = vector.load %arg8[%c0_105, %113, %c0_106] : memref<1x64x8xf32, #tpu.memory_space<vmem>>, vector<1x64x8xf32>
    %115 = vector.shape_cast %114 : vector<1x64x8xf32> to vector<64x8xf32>
    %116 = vector.shape_cast %110 : vector<64x8xf32> to vector<1x64x8xf32>
    tpu.vector_store %arg8[%c0_105, %113, %c0_106], %116 {strides = array<i32>} : memref<1x64x8xf32, #tpu.memory_space<vmem>>, vector<1x64x8xf32>,
    %c1_i32_107 = arith.constant 1 : i32
    return
  }
  func.func @transform_0(%arg0: i32) -> (i32, i32, i32, i32, i32) {
    %c0_i32 = arith.constant 0 : i32
    %c0_i32_0 = arith.constant 0 : i32
    %c0_i32_1 = arith.constant 0 : i32
    %c0_i32_2 = arith.constant 0 : i32
    %c0_i32_3 = arith.constant 0 : i32
    return %arg0, %c0_i32, %c0_i32_0, %c0_i32_1, %c0_i32_2 : i32, i32, i32, i32, i32
  }
  func.func @transform_1(%arg0: i32) -> (i32, i32) {
    %c0_i32 = arith.constant 0 : i32
    %c0_i32_0 = arith.constant 0 : i32
    %c0_i32_1 = arith.constant 0 : i32
    return %c0_i32, %c0_i32_0 : i32, i32
  }
  func.func @transform_2(%arg0: i32) -> (i32, i32) {
    %c0_i32 = arith.constant 0 : i32
    %c0_i32_0 = arith.constant 0 : i32
    %c0_i32_1 = arith.constant 0 : i32
    return %c0_i32, %c0_i32_0 : i32, i32
  }
  func.func @transform_3(%arg0: i32) -> (i32, i32) {
    %c0_i32 = arith.constant 0 : i32
    %c0_i32_0 = arith.constant 0 : i32
    %c0_i32_1 = arith.constant 0 : i32
    return %c0_i32, %c0_i32_0 : i32, i32
  }
  func.func @transform_4(%arg0: i32) -> (i32, i32) {
    %c0_i32 = arith.constant 0 : i32
    %c0_i32_0 = arith.constant 0 : i32
    %c0_i32_1 = arith.constant 0 : i32
    return %c0_i32, %c0_i32_0 : i32, i32
  }
  func.func @transform_5(%arg0: i32) -> (i32, i32) {
    %c0_i32 = arith.constant 0 : i32
    %c0_i32_0 = arith.constant 0 : i32
    %c0_i32_1 = arith.constant 0 : i32
    return %c0_i32, %c0_i32_0 : i32, i32
  }
  func.func @transform_6(%arg0: i32) -> (i32, i32) {
    %c0_i32 = arith.constant 0 : i32
    %c0_i32_0 = arith.constant 0 : i32
    %c0_i32_1 = arith.constant 0 : i32
    return %c0_i32, %c0_i32_0 : i32, i32
  }
  func.func @transform_7(%arg0: i32) -> (i32, i32, i32) {
    %c0_i32 = arith.constant 0 : i32
    %c0_i32_0 = arith.constant 0 : i32
    %c0_i32_1 = arith.constant 0 : i32
    return %arg0, %c0_i32, %c0_i32_0 : i32, i32, i32
  }
}

</mosaic_0001>

<bundles_post_ra>
// kernel: tpu_custom_call.1
= control target key start
LH: loop header
LB: loop body
LE: loop exit
PB: predicated region body
PF: predicated region fallthrough
CT: control target
= control target key end

     0   :  { %12 = vsyncpa [#allocation5], 0  ;;  %s2808_s0 = inlined_call_operand.hbm [shape: f32[2,8,2,8,8], index: 0, kind: input, shape index: {}]   ;;  %s2809_s1 = inlined_call_operand.vmem [shape: bf16[36,8], index: 1, kind: input, shape index: {}]   ;;  %s2810_s2 = inlined_call_operand.vmem [shape: f32[1,8], index: 2, kind: input, shape index: {}]   ;;  %s2811_s3 = inlined_call_operand.vmem [shape: f32[1,8], index: 3, kind: input, shape index: {}]   ;;  %s2812_s4 = inlined_call_operand.vmem [shape: bf16[72,8], index: 4, kind: input, shape index: {}]   ;;  %s2813_s5 = inlined_call_operand.vmem [shape: f32[1,8], index: 5, kind: input, shape index: {}]   ;;  %s2814_s6 = inlined_call_operand.vmem [shape: f32[1,8], index: 6, kind: input, shape index: {}]   ;;  %s2815_s7 = inlined_call_operand.vmem [shape: f32[2,64,8], index: 7, kind: output, shape index: {}]  }
   0x1   :  { %14 = vsyncpa [#allocation5 + $0x1], 0  ;;  %s2213_s24 = smov 0   ;;  %s2215_s25 = smov 0  }
   0x2   :  { %s2217_s26 = smov 0   ;;  %s2219_s27 = smov 0  }
   0x3 LB: > { %s2232_s28 = sadd.s32 4294967295, %s2154_s27   ;;  %s2235_s29 = sadd.s32 1, %s2154_s27   ;;  %s2154_s27 = sphi %s2219_s27, %s2824_s27   ;;  %s2150_s26 = sphi %s2217_s26, %s2823_s26   ;;  %s2146_s25 = sphi %s2215_s25, %s2822_s25   ;;  %s2142_s24 = sphi %s2213_s24, %s2821_s24  }
   0x4   : > { %s24_s30 = ssub.s32 %s2154_s27, %s2235_s29  ;;  %s27_s8 = sadd.s32 1, %s2150_s26 }
   0x5   : > { %p25_p0 = scmp.eq.s32.totalorder %s24_s30, 0  ;;  %p34_p1 = scmp.ne.s32.totalorder %s2150_s26, %s2146_s25 }
   0x6   : > { %p35_p2 = scmp.eq.s32.totalorder %s2154_s27, 0  ;;  %p40_p3 = scmp.ne.s32.totalorder %s2146_s25, %s2142_s24 }
   0x7   : > { %s2245_s9 = scalar_select %p25_p0, %s2150_s26, %s27_s8  }
   0x8   : > { %p36_p4 = por %p35_p2, %p34_p1  ;;  %p41_p5 = scmp.eq.s32.totalorder %s2232_s28, 0 }
   0x9   : > { %p1715_p6 = scmp.lt.s32.totalorder %s2154_s27, 2  ;;  %s234_s11 = sand.u32 1, %s2150_s26  }
   0xa   : > { %p2249_p7 = por %p41_p5, %p40_p3  ;;  %s1628_s12 = sshll.u32 %s234_s11, 7 }
   0xb   : > { %s1657_s13 = sshll.u32 %s2154_s27, 11  ;;  %s238_s17 = scalar_lea.vmem [#allocation4], %s1628_s12 }
   0xc   : > { %s2817_s10 = scalar_select %p2249_p7, 1, 0 }
   0xd   : > { %s2258_s16 = scalar_lea.hbm %s2808_s0, %s1657_s13  ;;  %s245_s18 = sshll.u32 %s238_s17, 4  ;;  %s2260_s18 = int_to_ptr.vmem [resolvable:$true] %s245_s18 }
   0xe   : > { %p2262_p8 = pnand %p1715_p6, %p36_p4  ;;  %s2267_s20 = scalar_lea.sflag [#allocation5], %s234_s11 }
   0xf   : > { %s2092_s21 = scalar_lea.hbm %s2258_s16, 2048  ;;  %s2097_s24 = scalar_lea.hbm %s2808_s0, 4096 }
  0x10   : > { %p2093_p10 = scmp.ne.s32.totalorder %s2258_s16, %s2092_s21  ;;  %p2094_p11 = pneg %p2262_p8 }
  0x11   : > { %p2098_p0 = scmp.lt.s32.totalorder %s2258_s16, %s2808_s0  ;;  %p2099_p1 = scmp.lt.s32.totalorder %s2097_s24, %s2092_s21 }
  0x12   : > { %p2095_p12 = pnand %p2094_p11, %p2093_p10 }
  0x13   : > { %p2100_p2 = por %p2099_p1, %p2098_p0 }
  0x14   : > { %p2096_p13 = pneg %p2095_p12 }
  0x16   : > { %p2101_p3 = pnand %p2100_p2, %p2096_p13 }
  0x18   : > { %2104 = shalt.err (!%p2101_p3)
}
  0x19   : > { %s2105_s11 = scalar_lea.vmem %s2260_s18, 2048  ;;  %s2156_s12 = smov [#allocation4]  }
  0x1a   : > { %p2106_p4 = scmp.ne.s32.totalorder %s2260_s18, %s2105_s11  ;;  %s2110_s13 = sshll.u32 %s2156_s12, 4  ;;  %s2111_s13 = int_to_ptr.vmem [resolvable:$false] %s2110_s13 }
  0x1b   : > { %s2112_s14 = scalar_lea.vmem %s2111_s13, 4096  ;;  %p2113_p10 = scmp.lt.s32.totalorder %s2260_s18, %s2111_s13 }
  0x1c   : > { %p2108_p5 = pnand %p2106_p4, %p2094_p11  ;;  %p2114_p12 = scmp.lt.s32.totalorder %s2112_s14, %s2105_s11 }
  0x1e   : > { %p2109_p6 = pneg %p2108_p5  ;;  %p2115_p9 = por %p2114_p12, %p2113_p10 }
  0x20   : > { %p2116_p7 = pnand %p2115_p9, %p2109_p6 }
  0x22   : > { %2119 = shalt.err (!%p2116_p7)
}
  0x23   : > { %s2157_s15 = smov 128   ;;  %s2158_s17 = smov 8  }
  0x24   : > { %1714 = dma.hbm_to_vmem [thread:$0]  (!%p2262_p8), %s2258_s16, 2048, %s2260_s18, %s2267_s20, %s2157_s15, %s2157_s15, %s2158_s17  }
  0x25   : > { %p253_p11 = scmp.lt.s32.totalorder %s2154_s27, 3  ;;  %p2819_p13 = scmp.ge.s32.totalorder %s2154_s27, 1 }
  0x27   : > { %p254_p0 = pnand %p2819_p13, %p253_p11 }
  0x28   : > { %s259_s21 = sand.u32 (!%p254_p0), 1, %s2146_s25   ;;  %p2820_p7 = scmp.ne.s32.totalorder (!%p254_p0), %s2817_s10, 0 }
  0x29   : > { %257 = sbr.rel (%p254_p0) target bundleno = 941 (0x3ad), region = 48  ;;  %s1632_s22 = sshll.u32 (!%p254_p0), %s259_s21, 7 }
  0x2a   : > { %s260_s23 = scalar_lea.sflag (!%p254_p0), [#allocation5], %s259_s21  ;;  %s2292_s24 = scalar_lea.vmem (!%p254_p0), [#allocation4], %s1632_s22 }
  0x2e   : > { %2137 = dma.done.wait (%p2820_p7), %s260_s23, 2048  }
  0x2f   : > { %2139 = vsyncadd (%p2820_p7), %s260_s23, 4294965248  ;;  %vm300_vm0 = vcmask 31744   ;;  %vm302_vm1 = vcmask 25600   ;;  %vm307_vm2 = vcmask 24576   ;;  %v2159_v0 = vmov 0.0   ;;  %v360_v1 = vld [vmem:[%s2292_s24 + $0x20] sm:$0xff] }
  0x30   : > { %301 = vst.msk [vmem:[#allocation2] sm:$0xff] %vm300_vm0, %v2159_v0  ;;  %305 = vst.msk [vmem:[#allocation2 + $0x90] sm:$0xff] %vm300_vm0, %v2159_v0  ;;  %v361_v2 = vld [vmem:[%s2292_s24 + $0x28] sm:$0xff]  ;;  %v356_v3 = vld [vmem:[%s2292_s24] sm:$0xff]  ;;  %s2160_s27 = smov 124   ;;  %vm328_vm3 = vcmask 64512  }
  0x31   : > { %303 = vst.msk [vmem:[#allocation2 + $0x8] sm:$0x3] %vm302_vm1, %v2159_v0  ;;  %306 = vst.msk [vmem:[#allocation2 + $0x98] sm:$0x3] %vm302_vm1, %v2159_v0  ;;  %v374_v4 = vmax.f32 %v360_v1, %v361_v2  ;;  %v357_v5 = vld [vmem:[%s2292_s24 + $0x8] sm:$0xff]  ;;  %v362_v6 = vld [vmem:[%s2292_s24 + $0x30] sm:$0xff] }
  0x32   : > { %319 = vst.msk [vmem:[#allocation2 + $0x19] sm:$0x1] %vm307_vm2, %v2159_v0  ;;  %309 = vst.msk [vmem:[#allocation2 + $0x10] sm:$0x1] %vm307_vm2, %v2159_v0  ;;  %v363_v7 = vld [vmem:[%s2292_s24 + $0x38] sm:$0xff]  ;;  %v372_v8 = vmax.f32 %v356_v3, %v357_v5  ;;  %v358_v9 = vld [vmem:[%s2292_s24 + $0x10] sm:$0xff] }
  0x33   : > { %310 = vst.msk [vmem:[#allocation2 + $0x20] sm:$0x1] %vm307_vm2, %v2159_v0  ;;  %311 = vst.msk [vmem:[#allocation2 + $0x30] sm:$0x1] %vm307_vm2, %v2159_v0  ;;  %v359_v10 = vld [vmem:[%s2292_s24 + $0x18] sm:$0xff]  ;;  %392 = vrot.lane.b32.xlu1 %v374_v4, %s2160_s27  ;;  %v375_v11 = vmax.f32 %v362_v6, %v363_v7  ;;  %v366_v13 = vld [vmem:[%s2292_s24 + $0x50] sm:$0xff] }
  0x34   : > { %312 = vst.msk [vmem:[#allocation2 + $0x40] sm:$0x1] %vm307_vm2, %v2159_v0  ;;  %313 = vst.msk [vmem:[#allocation2 + $0x50] sm:$0x1] %vm307_vm2, %v2159_v0  ;;  %388 = vrot.lane.b32.xlu0 %v372_v8, %s2160_s27  ;;  %v373_v12 = vmax.f32 %v358_v9, %v359_v10  ;;  %v367_v14 = vld [vmem:[%s2292_s24 + $0x58] sm:$0xff]  ;;  %v364_v15 = vld [vmem:[%s2292_s24 + $0x40] sm:$0xff] }
  0x35   : > { %314 = vst.msk [vmem:[#allocation2 + $0x60] sm:$0x1] %vm307_vm2, %v2159_v0  ;;  %315 = vst.msk [vmem:[#allocation2 + $0x70] sm:$0x1] %vm307_vm2, %v2159_v0  ;;  %v365_v16 = vld [vmem:[%s2292_s24 + $0x48] sm:$0xff]  ;;  %v370_v17 = vld [vmem:[%s2292_s24 + $0x70] sm:$0xff]  ;;  %v377_v19 = vmax.f32 %v366_v13, %v367_v14 }
  0x36   : > { %316 = vst.msk [vmem:[#allocation2 + $0x80] sm:$0x1] %vm307_vm2, %v2159_v0  ;;  %320 = vst.msk [vmem:[#allocation2 + $0x29] sm:$0x1] %vm307_vm2, %v2159_v0  ;;  %v371_v18 = vld [vmem:[%s2292_s24 + $0x78] sm:$0xff]  ;;  %v368_v20 = vld [vmem:[%s2292_s24 + $0x60] sm:$0xff]  ;;  %v376_v22 = vmax.f32 %v364_v15, %v365_v16 }
  0x37   : > { %321 = vst.msk [vmem:[#allocation2 + $0x39] sm:$0x1] %vm307_vm2, %v2159_v0  ;;  %322 = vst.msk [vmem:[#allocation2 + $0x49] sm:$0x1] %vm307_vm2, %v2159_v0  ;;  %394 = vrot.lane.b32.xlu1 %v375_v11, %s2160_s27  ;;  %v369_v21 = vld [vmem:[%s2292_s24 + $0x68] sm:$0xff]  ;;  %v379_v23 = vmax.f32 %v370_v17, %v371_v18  ;;  %s2161_s10 = smov 4  }
  0x38   : > { %323 = vst.msk [vmem:[#allocation2 + $0x59] sm:$0x1] %vm307_vm2, %v2159_v0  ;;  %324 = vst.msk [vmem:[#allocation2 + $0x69] sm:$0x1] %vm307_vm2, %v2159_v0  ;;  %390 = vrot.lane.b32.xlu0 %v373_v12, %s2160_s27  ;;  %v378_v24 = vmax.f32 %v368_v20, %v369_v21  ;;  %v439_v35 = vld [vmem:[#allocation2 + $0x1] sm:$0xff]  ;;  %s2162_s16 = smov 8  }
  0x39   : > { %325 = vst.msk [vmem:[#allocation2 + $0x79] sm:$0x1] %vm307_vm2, %v2159_v0  ;;  %326 = vst.msk [vmem:[#allocation2 + $0x89] sm:$0x1] %vm307_vm2, %v2159_v0  ;;  %s2163_s18 = smov 12   ;;  %s2164_s30 = smov 16  }
  0x3a   : > { %318 = vst.msk [vmem:[#allocation2 + $0x9] sm:$0x1] %vm307_vm2, %v2159_v0  ;;  %308 = vst.msk [vmem:[#allocation2] sm:$0x1] %vm307_vm2, %v2159_v0  ;;  %vm872_vm4 = vcmask 1041408   ;;  %v2085_v3 = vld [vmem:[%s2809_s1 + $0x8] sm:$0xff]  }
  0x3b   : > { %317 = vst.msk [vmem:[#allocation2 + $0x90] sm:$0x1] %vm307_vm2, %v2159_v0  ;;  %327 = vst.msk [vmem:[#allocation2 + $0x99] sm:$0x1] %vm307_vm2, %v2159_v0  ;;  %398 = vrot.lane.b32.xlu1 %v377_v19, %s2160_s27  ;;  %s2165_s12 = smov 20   ;;  %v2086_v7 = vld [vmem:[%s2809_s1] sm:$0xff]  }
  0x3c   : > { %396 = vrot.lane.b32.xlu0 %v376_v22, %s2160_s27  ;;  %329 = vst.msk [vmem:[#allocation3] sm:$0xff] %vm328_vm3, %v2159_v0  ;;  %333 = vst.msk [vmem:[#allocation3 + $0x90] sm:$0xff] %vm328_vm3, %v2159_v0  ;;  %v2084_v61 = vld [vmem:[%s2809_s1 + $0x10] ss:$0 sps:$4 sm:$0x33]   ;;  %s2166_s15 = smov 24  }
  0x3d   : > { %1707 = vmatprep.subr.msk.bf16.mxu0 %vm872_vm4, %v2084_v61  ;;  %v874_v62 = vsel %vm872_vm4, %v2084_v61, 0  ;;  %s2167_s17 = smov 28   ;;  %s2168_s21 = smov 32   ;;  %vm781_vm5 = vcmask 97280   ;;  %vm790_vm6 = vcmask 130048   ;;  %vm799_vm7 = vcmask 162816  }
  0x3e   : > { %1676 = vmatpush3.bf16.msra.mxu0 %v874_v62  ;;  %vm808_vm8 = vcmask 195584   ;;  %vm817_vm9 = vcmask 228352   ;;  %vm826_vm10 = vcmask 261120   ;;  %vm859_vm11 = vcmask 293888   ;;  %s2169_s19 = smov 40   ;;  %s2170_s13 = smov 48  }
  0x3f   : > { %402 = vrot.lane.b32.xlu1 %v379_v23, %s2160_s27  ;;  %1677 = vmatprep.subr.bf16.mxu0 %v2085_v3  ;;  %vm335_vm12 = vcmask 57344   ;;  %vm330_vm13 = vcmask 58368   ;;  %vm1439_vm14 = vcmask 1043456   ;;  %s2171_s22 = smov 56   ;;  %vm1350_vm15 = vcmask 326656   ;;  %p294_p8 = scmp.lt.s32.totalorder %s2232_s28, 1 }
  0x40   : > { %400 = vrot.lane.b32.xlu0 %v378_v24, %s2160_s27  ;;  %339 = vst.msk [vmem:[#allocation3 + $0x30] sm:$0x1] %vm335_vm12, %v2159_v0  ;;  %340 = vst.msk [vmem:[#allocation3 + $0x40] sm:$0x1] %vm335_vm12, %v2159_v0  ;;  %s2172_s27 = smov 64   ;;  %vm1368_vm1 = vcmask 457728  }
  0x41   : > { %v447_v42 = vld [vmem:[#allocation2 + $0x2] sm:$0xff]  ;;  %336 = vst.msk [vmem:[#allocation3] sm:$0x1] %vm335_vm12, %v2159_v0  ;;  %337 = vst.msk [vmem:[#allocation3 + $0x10] sm:$0x1] %vm335_vm12, %v2159_v0  ;;  %vm1377_vm2 = vcmask 523264  }
  0x42   : > { %1678 = vmatpush3.bf16.msra.mxu0 %v2085_v3  ;;  %338 = vst.msk [vmem:[#allocation3 + $0x20] sm:$0x1] %vm335_vm12, %v2159_v0  ;;  %341 = vst.msk [vmem:[#allocation3 + $0x50] sm:$0x1] %vm335_vm12, %v2159_v0  ;;  %vm1426_vm4 = vcmask 588800   ;;  %s2826_s28 = smov (!%p294_p8, %s2232_s28), 1 }
  0x43   : > { %1679 = vmatprep.subr.bf16.mxu0 %v2086_v7  ;;  %342 = vst.msk [vmem:[#allocation3 + $0x60] sm:$0x1] %vm335_vm12, %v2159_v0  ;;  %343 = vst.msk [vmem:[#allocation3 + $0x70] sm:$0x1] %vm335_vm12, %v2159_v0 }
  0x44   : > { %344 = vst.msk [vmem:[#allocation3 + $0x80] sm:$0x1] %vm335_vm12, %v2159_v0  ;;  %345 = vst.msk [vmem:[#allocation3 + $0x90] sm:$0x1] %vm335_vm12, %v2159_v0 }
  0x45   : > { %347 = vst.msk [vmem:[#allocation3 + $0x19] sm:$0x1] %vm335_vm12, %v2159_v0  ;;  %348 = vst.msk [vmem:[#allocation3 + $0x29] sm:$0x1] %vm335_vm12, %v2159_v0 }
  0x46   : > { %1680 = vmatpush3.bf16.msra.mxu0 %v2086_v7  ;;  %349 = vst.msk [vmem:[#allocation3 + $0x39] sm:$0x1] %vm335_vm12, %v2159_v0  ;;  %350 = vst.msk [vmem:[#allocation3 + $0x49] sm:$0x1] %vm335_vm12, %v2159_v0 }
  0x47   : > { %351 = vst.msk [vmem:[#allocation3 + $0x59] sm:$0x1] %vm335_vm12, %v2159_v0  ;;  %352 = vst.msk [vmem:[#allocation3 + $0x69] sm:$0x1] %vm335_vm12, %v2159_v0 }
  0x48   : > { %353 = vst.msk [vmem:[#allocation3 + $0x79] sm:$0x1] %vm335_vm12, %v2159_v0  ;;  %354 = vst.msk [vmem:[#allocation3 + $0x89] sm:$0x1] %vm335_vm12, %v2159_v0 }
  0x49   : > { %331 = vst.msk [vmem:[#allocation3 + $0x8] sm:$0x3] %vm330_vm13, %v2159_v0  ;;  %334 = vst.msk [vmem:[#allocation3 + $0x98] sm:$0x3] %vm330_vm13, %v2159_v0 }
  0x4a   : > { %346 = vst.msk [vmem:[#allocation3 + $0x9] sm:$0x1] %vm335_vm12, %v2159_v0  ;;  %355 = vst.msk [vmem:[#allocation3 + $0x99] sm:$0x1] %vm335_vm12, %v2159_v0 }
  0xa5   : > { %v393_v25 = vpop.permute.xlu1 %392 }
  0xa6   : > { %v414_v26 = vmax.f32 %v374_v4, %v393_v25  ;;  %v389_v27 = vpop.permute.xlu0 %388 }
  0xa7   : > { %v412_v28 = vmax.f32 %v372_v8, %v389_v27 }
  0xa8   : > { %423 = vst.msk [vmem:[#allocation2 + $0x31] sm:$0xff] %vm300_vm0, %v414_v26 }
  0xa9   : > { %421 = vst.msk [vmem:[#allocation2 + $0x11] sm:$0xff] %vm300_vm0, %v412_v28  ;;  %v395_v29 = vpop.permute.xlu1 %394 }
  0xaa   : > { %v415_v30 = vmax.f32 %v375_v11, %v395_v29  ;;  %v391_v31 = vpop.permute.xlu0 %390 }
  0xab   : > { %v413_v32 = vmax.f32 %v373_v12, %v391_v31  ;;  %v492_v31 = vld [vmem:[#allocation2 + $0x90] sm:$0xff] }
  0xac   : > { %424 = vst.msk [vmem:[#allocation2 + $0x41] sm:$0xff] %vm300_vm0, %v415_v30 }
  0xad   : > { %422 = vst.msk [vmem:[#allocation2 + $0x21] sm:$0xff] %vm300_vm0, %v413_v32  ;;  %v399_v33 = vpop.permute.xlu1 %398 }
  0xae   : > { %v397_v34 = vpop.permute.xlu0 %396  ;;  %v417_v36 = vmax.f32 %v377_v19, %v399_v33  ;;  %v500_v33 = vld [vmem:[#allocation2 + $0x91] sm:$0xff] }
  0xaf   : > { %v416_v37 = vmax.f32 %v376_v22, %v397_v34  ;;  %v442_v41 = vld [vmem:[#allocation2 + $0x31] sm:$0xff] }
  0xb0   : > { %v440_v38 = vld [vmem:[#allocation2 + $0x11] sm:$0xff]  ;;  %426 = vst.msk [vmem:[#allocation2 + $0x61] sm:$0xff] %vm300_vm0, %v417_v36 }
  0xb1   : > { %425 = vst.msk [vmem:[#allocation2 + $0x51] sm:$0xff] %vm300_vm0, %v416_v37  ;;  %v1764_v39 = vpack.i.bf16 %v440_v38, %v439_v35  ;;  %v403_v40 = vpop.permute.xlu1 %402  ;;  %v448_v43 = vld [vmem:[#allocation2 + $0x12] sm:$0xff] }
  0xb2   : > { %v419_v44 = vmax.f32 %v379_v23, %v403_v40  ;;  %v401_v45 = vpop.permute.xlu0 %400  ;;  %v1774_v49 = vpack.i.bf16 %v448_v43, %v447_v42  ;;  %v450_v51 = vld [vmem:[#allocation2 + $0x32] sm:$0xff] }
  0xb3   : > { %1765 = vrot.lane.b32.xlu0 %v1764_v39, %s2161_s10  ;;  %v418_v46 = vmax.f32 %v378_v24, %v401_v45  ;;  %v2377_v53 = vld [vmem:[#allocation2 + $0x10] sm:$0xff]  ;;  %v2383_v57 = vld [vmem:[#allocation2 + $0x40] sm:$0xff] }
  0xb4   : > { %v441_v47 = vld [vmem:[#allocation2 + $0x21] sm:$0xff]  ;;  %428 = vst.msk [vmem:[#allocation2 + $0x81] sm:$0xff] %vm300_vm0, %v419_v44  ;;  %v2381_v56 = vld [vmem:[#allocation2 + $0x30] sm:$0xff] }
  0xb5   : > { %v1769_v48 = vpack.i.bf16 %v442_v41, %v441_v47  ;;  %427 = vst.msk [vmem:[#allocation2 + $0x71] sm:$0xff] %vm300_vm0, %v418_v46  ;;  %v449_v50 = vld [vmem:[#allocation2 + $0x22] sm:$0xff]  ;;  %v1789_v58 = vpack.i.bf16 %v2383_v57, %v2381_v56  ;;  %v1794_v59 = vpack.i.bf16 %v441_v47, %v440_v38  ;;  %v508_v35 = vld [vmem:[#allocation2 + $0x92] sm:$0xff] }
  0xb6   : > { %v2373_v52 = vld [vmem:[#allocation2 + $0x20] sm:$0xff]  ;;  %v1779_v54 = vpack.i.bf16 %v450_v51, %v449_v50  ;;  %v1804_v1 = vpack.i.bf16 %v449_v50, %v448_v43 }
  0xb7   : > { %1770 = vrot.lane.b32.xlu1 %v1769_v48, %s2161_s10  ;;  %1775 = vrot.lane.b32.xlu0 %v1774_v49, %s2162_s16  ;;  %v1784_v55 = vpack.i.bf16 %v2373_v52, %v2377_v53  ;;  %v469_v60 = vld [vmem:[#allocation2 + $0x41] sm:$0xff]  ;;  %v1814_v5 = vpack.i.bf16 %v2381_v56, %v2373_v52 }
  0xb8   : > { %v1799_v63 = vpack.i.bf16 %v469_v60, %v442_v41  ;;  %v477_v2 = vld [vmem:[#allocation2 + $0x42] sm:$0xff]  ;;  %v2401_v6 = vld [vmem:[#allocation2 + $0x50] sm:$0xff] }
  0xb9   : > { %v1809_v4 = vpack.i.bf16 %v477_v2, %v450_v51  ;;  %v1819_v8 = vpack.i.bf16 %v2401_v6, %v2383_v57  ;;  %v496_v9 = vld [vmem:[#allocation2 + $0x51] sm:$0xff]  ;;  %v445_v14 = vld [vmem:[#allocation2 + $0x61] sm:$0xff] }
  0xba   : > { %v1829_v10 = vpack.i.bf16 %v496_v9, %v469_v60  ;;  %v504_v11 = vld [vmem:[#allocation2 + $0x52] sm:$0xff]  ;;  %v2416_v17 = vld [vmem:[#allocation2 + $0x60] sm:$0xff]  ;;  %v1874_v24 = vpack.i.bf16 %v445_v14, %v496_v9 }
  0xbb   : > { %1780 = vrot.lane.b32.xlu1 %v1779_v54, %s2162_s16  ;;  %1785 = vrot.lane.b32.xlu0 %v1784_v55, %s2163_s18  ;;  %v1844_v13 = vpack.i.bf16 %v504_v11, %v477_v2  ;;  %v453_v18 = vld [vmem:[#allocation2 + $0x62] sm:$0xff]  ;;  %v1864_v20 = vpack.i.bf16 %v2416_v17, %v2401_v6 }
  0xbc   : > { %v446_v12 = vld [vmem:[#allocation2 + $0x71] sm:$0xff]  ;;  %v465_v22 = vld [vmem:[#allocation2 + $0x80] sm:$0xff]  ;;  %v1884_v27 = vpack.i.bf16 %v453_v18, %v504_v11 }
  0xbd   : > { %v1849_v15 = vpack.i.bf16 %v446_v12, %v445_v14  ;;  %v454_v16 = vld [vmem:[#allocation2 + $0x72] sm:$0xff]  ;;  %v473_v25 = vld [vmem:[#allocation2 + $0x81] sm:$0xff]  ;;  %v1899_v32 = vpack.i.bf16 %v492_v31, %v465_v22 }
  0xbe   : > { %v1859_v19 = vpack.i.bf16 %v454_v16, %v453_v18  ;;  %v2422_v21 = vld [vmem:[#allocation2 + $0x70] sm:$0xff]  ;;  %v1879_v26 = vpack.i.bf16 %v473_v25, %v446_v12  ;;  %v481_v28 = vld [vmem:[#allocation2 + $0x82] sm:$0xff]  ;;  %v1909_v34 = vpack.i.bf16 %v500_v33, %v473_v25 }
  0xbf   : > { %1790 = vrot.lane.b32.xlu1 %v1789_v58, %s2163_s18  ;;  %1795 = vrot.lane.b32.xlu0 %v1794_v59, %s2164_s30  ;;  %v1869_v23 = vpack.i.bf16 %v465_v22, %v2422_v21  ;;  %v1889_v29 = vpack.i.bf16 %v481_v28, %v454_v16  ;;  %v1894_v30 = vpack.i.bf16 %v2422_v21, %v2416_v17 }
  0xc0   : > { %v1919_v36 = vpack.i.bf16 %v508_v35, %v481_v28 }
  0xc3   : > { %1800 = vrot.lane.b32.xlu1 %v1799_v63, %s2164_s30  ;;  %1805 = vrot.lane.b32.xlu0 %v1804_v1, %s2165_s12 }
  0xc7   : > { %1810 = vrot.lane.b32.xlu1 %v1809_v4, %s2165_s12  ;;  %1815 = vrot.lane.b32.xlu0 %v1814_v5, %s2166_s15 }
  0xcb   : > { %1820 = vrot.lane.b32.xlu1 %v1819_v8, %s2166_s15  ;;  %1825 = vrot.lane.b32.xlu0 %v1769_v48, %s2167_s17  ;;  %v431_v48 = vld [vmem:[#allocation2] sm:$0xff] }
  0xcf   : > { %1830 = vrot.lane.b32.xlu1 %v1829_v10, %s2167_s17  ;;  %1835 = vrot.lane.b32.xlu0 %v1779_v54, %s2168_s21 }
  0xd3   : > { %1840 = vrot.lane.b32.xlu1 %v1829_v10, %s2161_s10  ;;  %1845 = vrot.lane.b32.xlu0 %v1844_v13, %s2168_s21 }
  0xd7   : > { %1850 = vrot.lane.b32.xlu1 %v1849_v15, %s2161_s10  ;;  %1855 = vrot.lane.b32.xlu0 %v1844_v13, %s2162_s16  ;;  %s1658_s10 = sshll.u32 %s2826_s28, 6 }
  0xd8   : > { %s2777_s20 = scalar_lea.vmem %s2815_s7, %s1658_s10 }
  0xdb   : > { %1860 = vrot.lane.b32.xlu1 %v1859_v19, %s2162_s16  ;;  %1865 = vrot.lane.b32.xlu0 %v1864_v20, %s2163_s18 }
  0xdf   : > { %1870 = vrot.lane.b32.xlu1 %v1869_v23, %s2163_s18  ;;  %1875 = vrot.lane.b32.xlu0 %v1874_v24, %s2164_s30 }
  0xe3   : > { %1880 = vrot.lane.b32.xlu1 %v1879_v26, %s2164_s30  ;;  %1885 = vrot.lane.b32.xlu0 %v1884_v27, %s2165_s12 }
  0xe7   : > { %1890 = vrot.lane.b32.xlu1 %v1889_v29, %s2165_s12  ;;  %1895 = vrot.lane.b32.xlu0 %v1894_v30, %s2166_s15 }
  0xeb   : > { %1900 = vrot.lane.b32.xlu1 %v1899_v32, %s2166_s15  ;;  %1905 = vrot.lane.b32.xlu0 %v1849_v15, %s2167_s17 }
  0xef   : > { %1910 = vrot.lane.b32.xlu1 %v1909_v34, %s2167_s17  ;;  %1915 = vrot.lane.b32.xlu0 %v1859_v19, %s2168_s21 }
  0xf3   : > { %1920 = vrot.lane.b32.xlu1 %v1919_v36, %s2168_s21 }
 0x125   : > { %v1766_v37 = vpop.permute.xlu0 %1765 }
 0x126   : > { %v1768_v44 = vunpack.i.h.bf16 %v1766_v37  ;;  %v1767_v45 = vunpack.i.l.bf16 %v1766_v37 }
 0x128   : > { %v766_v55 = vsel %vm300_vm0, %v2377_v53, %v1768_v44  ;;  %v765_v58 = vsel %vm300_vm0, %v431_v48, %v1767_v45 }
 0x129   : > { %v1771_v38 = vpop.permute.xlu1 %1770  ;;  %v1776_v39 = vpop.permute.xlu0 %1775 }
 0x12a   : > { %v1773_v49 = vunpack.i.h.bf16 %v1771_v38  ;;  %v1772_v50 = vunpack.i.l.bf16 %v1771_v38  ;;  %v1778_v51 = vunpack.i.h.bf16 %v1776_v39  ;;  %v1777_v54 = vunpack.i.l.bf16 %v1776_v39 }
 0x12c   : > { %v767_v4 = vsel %vm300_vm0, %v2373_v52, %v1772_v50  ;;  %v768_v5 = vsel %vm300_vm0, %v2381_v56, %v1773_v49  ;;  %v773_v53 = vsel %vm328_vm3, %v765_v58, %v1777_v54  ;;  %v774_v9 = vsel %vm328_vm3, %v766_v55, %v1778_v51 }
 0x12d   : > { %v1781_v40 = vpop.permute.xlu1 %1780  ;;  %v1786_v41 = vpop.permute.xlu0 %1785 }
 0x12e   : > { %v1783_v59 = vunpack.i.h.bf16 %v1781_v40  ;;  %v1782_v60 = vunpack.i.l.bf16 %v1781_v40  ;;  %v1788_v63 = vunpack.i.h.bf16 %v1786_v41  ;;  %v1787_v1 = vunpack.i.l.bf16 %v1786_v41 }
 0x130   : > { %v775_v12 = vsel %vm328_vm3, %v767_v4, %v1782_v60  ;;  %v776_v13 = vsel %vm328_vm3, %v768_v5, %v1783_v59  ;;  %v782_v18 = vsel %vm781_vm5, %v773_v53, %v1787_v1  ;;  %v783_v56 = vsel %vm781_vm5, %v774_v9, %v1788_v63 }
 0x131   : > { %v1791_v42 = vpop.permute.xlu1 %1790  ;;  %v1796_v43 = vpop.permute.xlu0 %1795 }
 0x132   : > { %v1793_v2 = vunpack.i.h.bf16 %v1791_v42  ;;  %v1792_v3 = vunpack.i.l.bf16 %v1791_v42  ;;  %v1798_v7 = vunpack.i.h.bf16 %v1796_v43  ;;  %v1797_v8 = vunpack.i.l.bf16 %v1796_v43 }
 0x134   : > { %v784_v19 = vsel %vm781_vm5, %v775_v12, %v1792_v3  ;;  %v785_v20 = vsel %vm781_vm5, %v776_v13, %v1793_v2  ;;  %v791_v22 = vsel %vm790_vm6, %v782_v18, %v1797_v8  ;;  %v792_v23 = vsel %vm790_vm6, %v783_v56, %v1798_v7 }
 0x135   : > { %v2440_v46 = vpop.permute.xlu1 %1800  ;;  %v1806_v47 = vpop.permute.xlu0 %1805 }
 0x136   : > { %v1808_v10 = vunpack.i.h.bf16 %v1806_v47  ;;  %v1807_v11 = vunpack.i.l.bf16 %v1806_v47  ;;  %v1803_v26 = vunpack.i.h.bf16 %v2440_v46  ;;  %v1802_v27 = vunpack.i.l.bf16 %v2440_v46 }
 0x138   : > { %v800_v28 = vsel %vm799_vm7, %v791_v22, %v1807_v11  ;;  %v801_v29 = vsel %vm799_vm7, %v792_v23, %v1808_v10  ;;  %v793_v44 = vsel %vm790_vm6, %v784_v19, %v1802_v27  ;;  %v794_v45 = vsel %vm790_vm6, %v785_v20, %v1803_v26 }
 0x139   : > { %v1811_v61 = vpop.permute.xlu1 %1810  ;;  %v1816_v62 = vpop.permute.xlu0 %1815 }
 0x13a   : > { %v1818_v14 = vunpack.i.h.bf16 %v1816_v62  ;;  %v1817_v15 = vunpack.i.l.bf16 %v1816_v62  ;;  %v1813_v30 = vunpack.i.h.bf16 %v1811_v61  ;;  %v1812_v31 = vunpack.i.l.bf16 %v1811_v61 }
 0x13c   : > { %v809_v32 = vsel %vm808_vm8, %v800_v28, %v1817_v15  ;;  %v810_v33 = vsel %vm808_vm8, %v801_v29, %v1818_v14  ;;  %v802_v48 = vsel %vm799_vm7, %v793_v44, %v1812_v31  ;;  %v803_v49 = vsel %vm799_vm7, %v794_v45, %v1813_v30 }
 0x13d   : > { %v1821_v16 = vpop.permute.xlu1 %1820  ;;  %v1826_v52 = vpop.permute.xlu0 %1825 }
 0x13e   : > { %v1828_v24 = vunpack.i.h.bf16 %v1826_v52  ;;  %v1827_v25 = vunpack.i.l.bf16 %v1826_v52  ;;  %v1823_v36 = vunpack.i.h.bf16 %v1821_v16  ;;  %v1822_v37 = vunpack.i.l.bf16 %v1821_v16 }
 0x140   : > { %v818_v42 = vsel %vm817_vm9, %v809_v32, %v1827_v25  ;;  %v819_v43 = vsel %vm817_vm9, %v810_v33, %v1828_v24  ;;  %v811_v55 = vsel %vm808_vm8, %v802_v48, %v1822_v37  ;;  %v812_v58 = vsel %vm808_vm8, %v803_v49, %v1823_v36 }
 0x141   : > { %v1831_v34 = vpop.permute.xlu1 %1830  ;;  %v1836_v35 = vpop.permute.xlu0 %1835 }
 0x142   : > { %v1838_v38 = vunpack.i.h.bf16 %v1836_v35  ;;  %v1837_v39 = vunpack.i.l.bf16 %v1836_v35  ;;  %v1833_v40 = vunpack.i.h.bf16 %v1831_v34  ;;  %v1832_v41 = vunpack.i.l.bf16 %v1831_v34 }
 0x144   : > { %v827_v46 = vsel %vm826_vm10, %v818_v42, %v1837_v39  ;;  %v828_v47 = vsel %vm826_vm10, %v819_v43, %v1838_v38  ;;  %v820_v61 = vsel %vm817_vm9, %v811_v55, %v1832_v41  ;;  %v821_v62 = vsel %vm817_vm9, %v812_v58, %v1833_v40 }
 0x145   : > { %v1841_v50 = vpop.permute.xlu1 %1840  ;;  %v1846_v51 = vpop.permute.xlu0 %1845  ;;  %v835_v54 = vpack.c.bf16 %v828_v47, %v827_v46 }
 0x146   : > { %v1848_v59 = vunpack.i.h.bf16 %v1846_v51  ;;  %v1847_v60 = vunpack.i.l.bf16 %v1846_v51  ;;  %v1843_v9 = vunpack.i.h.bf16 %v1841_v50  ;;  %v1842_v10 = vunpack.i.l.bf16 %v1841_v50 }
 0x147   : > { %1681 = vmatprep.mubr.msk.bf16.mxu0 %vm859_vm11, %v835_v54 }
 0x148   : > { %v830_v63 = vsel %vm826_vm10, %v821_v62, %v1848_v59  ;;  %v829_v1 = vsel %vm826_vm10, %v820_v61, %v1847_v60  ;;  %v770_v52 = vsel %vm300_vm0, %v2401_v6, %v1843_v9  ;;  %v769_v18 = vsel %vm300_vm0, %v2383_v57, %v1842_v10 }
 0x149   : > { %v836_v2 = vpack.c.bf16 %v830_v63, %v829_v1  ;;  %v1851_v3 = vpop.permute.xlu1 %1850  ;;  %v1856_v4 = vpop.permute.xlu0 %1855 }
 0x14a   : > { %v1853_v13 = vunpack.i.h.bf16 %v1851_v3  ;;  %v1852_v14 = vunpack.i.l.bf16 %v1851_v3  ;;  %v1858_v15 = vunpack.i.h.bf16 %v1856_v4  ;;  %v1857_v16 = vunpack.i.l.bf16 %v1856_v4 }
 0x14b   : > { %1682 = vmatmul.mubr.msk.bf16.vlgmr.msra.gmra.mxu0 %vm859_vm11, %v836_v2 }
 0x14c   : > { %v772_v27 = vsel %vm300_vm0, %v2422_v21, %v1853_v13  ;;  %v771_v28 = vsel %vm300_vm0, %v2416_v17, %v1852_v14  ;;  %v778_v6 = vsel %vm328_vm3, %v770_v52, %v1858_v15  ;;  %v777_v57 = vsel %vm328_vm3, %v769_v18, %v1857_v16 }
 0x14d   : > { %v1861_v5 = vpop.permute.xlu1 %1860  ;;  %v1866_v7 = vpop.permute.xlu0 %1865  ;;  %vm1359_vm0 = vcmask 392192  }
 0x14e   : > { %v1863_v56 = vunpack.i.h.bf16 %v1861_v5  ;;  %v1862_v19 = vunpack.i.l.bf16 %v1861_v5  ;;  %v1868_v23 = vunpack.i.h.bf16 %v1866_v7  ;;  %v1867_v24 = vunpack.i.l.bf16 %v1866_v7 }
 0x150   : > { %v779_v33 = vsel %vm328_vm3, %v771_v28, %v1862_v19  ;;  %v780_v34 = vsel %vm328_vm3, %v772_v27, %v1863_v56  ;;  %v786_v21 = vsel %vm781_vm5, %v777_v57, %v1867_v24  ;;  %v787_v17 = vsel %vm781_vm5, %v778_v6, %v1868_v23  ;;  %v2571_v23 = vld [vmem:[%s2811_s3] ss:$0 sm:$0xff] }
 0x151   : > { %v1871_v8 = vpop.permute.xlu1 %1870  ;;  %v1876_v53 = vpop.permute.xlu0 %1875 }
 0x152   : > { %v1873_v25 = vunpack.i.h.bf16 %v1871_v8  ;;  %v1872_v26 = vunpack.i.l.bf16 %v1871_v8  ;;  %v1878_v29 = vunpack.i.h.bf16 %v1876_v53  ;;  %v1877_v30 = vunpack.i.l.bf16 %v1876_v53 }
 0x154   : > { %v788_v39 = vsel %vm781_vm5, %v779_v33, %v1872_v26  ;;  %v789_v40 = vsel %vm781_vm5, %v780_v34, %v1873_v25  ;;  %v795_v41 = vsel %vm790_vm6, %v786_v21, %v1877_v30  ;;  %v796_v42 = vsel %vm790_vm6, %v787_v17, %v1878_v29  ;;  %v1005_v21 = vld [vmem:[#allocation3 + $0x2] sm:$0xff] }
 0x155   : > { %v1881_v11 = vpop.permute.xlu1 %1880  ;;  %v1886_v12 = vpop.permute.xlu0 %1885 }
 0x156   : > { %v1888_v31 = vunpack.i.h.bf16 %v1886_v12  ;;  %v1887_v32 = vunpack.i.l.bf16 %v1886_v12  ;;  %v1883_v45 = vunpack.i.h.bf16 %v1881_v11  ;;  %v1882_v46 = vunpack.i.l.bf16 %v1881_v11 }
 0x158   : > { %v804_v47 = vsel %vm799_vm7, %v795_v41, %v1887_v32  ;;  %v805_v48 = vsel %vm799_vm7, %v796_v42, %v1888_v31  ;;  %v797_v4 = vsel %vm790_vm6, %v788_v39, %v1882_v46  ;;  %v798_v5 = vsel %vm790_vm6, %v789_v40, %v1883_v45 }
 0x159   : > { %v1891_v20 = vpop.permute.xlu1 %1890  ;;  %v1896_v22 = vpop.permute.xlu0 %1895 }
 0x15a   : > { %v1898_v35 = vunpack.i.h.bf16 %v1896_v22  ;;  %v1897_v36 = vunpack.i.l.bf16 %v1896_v22  ;;  %v1893_v49 = vunpack.i.h.bf16 %v1891_v20  ;;  %v1892_v50 = vunpack.i.l.bf16 %v1891_v20  ;;  %v2566_v20 = vld [vmem:[%s2810_s2] ss:$0 sm:$0xff] }
 0x15c   : > { %v813_v51 = vsel %vm808_vm8, %v804_v47, %v1897_v36  ;;  %v814_v54 = vsel %vm808_vm8, %v805_v48, %v1898_v35  ;;  %v806_v53 = vsel %vm799_vm7, %v797_v4, %v1892_v50  ;;  %v807_v9 = vsel %vm799_vm7, %v798_v5, %v1893_v49  ;;  %v997_v36 = vld [vmem:[#allocation3 + $0x1] sm:$0xff]  ;;  %v2089_v4 = vld [vmem:[%s2812_s4 + $0x10] sm:$0xff]  }
 0x15d   : > { %v1901_v37 = vpop.permute.xlu1 %1900  ;;  %v1906_v38 = vpop.permute.xlu0 %1905 }
 0x15e   : > { %v1908_v43 = vunpack.i.h.bf16 %v1906_v38  ;;  %v1907_v44 = vunpack.i.l.bf16 %v1906_v38  ;;  %v1903_v59 = vunpack.i.h.bf16 %v1901_v37  ;;  %v1902_v60 = vunpack.i.l.bf16 %v1901_v37 }
 0x160   : > { %v822_v63 = vsel %vm817_vm9, %v813_v51, %v1907_v44  ;;  %v823_v1 = vsel %vm817_vm9, %v814_v54, %v1908_v43  ;;  %v816_v12 = vsel %vm808_vm8, %v807_v9, %v1903_v59  ;;  %v815_v13 = vsel %vm808_vm8, %v806_v53, %v1902_v60 }
 0x161   : > { %v1911_v55 = vpop.permute.xlu1 %1910  ;;  %v1916_v58 = vpop.permute.xlu0 %1915 }
 0x162   : > { %v1918_v61 = vunpack.i.h.bf16 %v1916_v58  ;;  %v1917_v62 = vunpack.i.l.bf16 %v1916_v58  ;;  %v1913_v2 = vunpack.i.h.bf16 %v1911_v55  ;;  %v1912_v3 = vunpack.i.l.bf16 %v1911_v55  ;;  %v2087_v55 = vld [vmem:[%s2812_s4 + $0x20] ss:$0 sps:$4 sm:$0xff]  }
 0x163   : > { %1708 = vmatprep.subr.msk.bf16.mxu1 %vm1439_vm14, %v2087_v55  ;;  %v1441_v59 = vsel %vm1439_vm14, %v2087_v55, 0 }
 0x164   : > { %v831_v7 = vsel %vm826_vm10, %v822_v63, %v1917_v62  ;;  %v832_v8 = vsel %vm826_vm10, %v823_v1, %v1918_v61  ;;  %v824_v16 = vsel %vm817_vm9, %v815_v13, %v1912_v3  ;;  %v825_v52 = vsel %vm817_vm9, %v816_v12, %v1913_v2  ;;  %1690 = vmatpush3.bf16.msra.mxu1 %v1441_v59  ;;  %v2088_v61 = vld [vmem:[%s2812_s4 + $0x18] sm:$0xff]  }
 0x165   : > { %v837_v10 = vpack.c.bf16 %v832_v8, %v831_v7  ;;  %v1921_v11 = vpop.permute.xlu1 %1920  ;;  %1691 = vmatprep.subr.bf16.mxu1 %v2088_v61 }
 0x166   : > { %v1923_v14 = vunpack.i.h.bf16 %v1921_v11  ;;  %v1922_v15 = vunpack.i.l.bf16 %v1921_v11 }
 0x167   : > { %1685 = vmatprep.mubr.msk.bf16.mxu0 %vm859_vm11, %v837_v10 }
 0x168   : > { %v833_v18 = vsel %vm826_vm10, %v824_v16, %v1922_v15  ;;  %v834_v56 = vsel %vm826_vm10, %v825_v52, %v1923_v14  ;;  %1692 = vmatpush3.bf16.msra.mxu1 %v2088_v61  ;;  %v2090_v52 = vld [vmem:[%s2812_s4 + $0x8] sm:$0xff]  }
 0x169   : > { %v838_v19 = vpack.c.bf16 %v834_v56, %v833_v18  ;;  %1693 = vmatprep.subr.bf16.mxu1 %v2089_v4 }
 0x16b   : > { %1686 = vmatmul.mubr.msk.bf16.gmra.mxu0 %vm859_vm11, %v838_v19 }
 0x16c   : > { %1694 = vmatpush3.bf16.msra.mxu1 %v2089_v4 }
 0x16d   : > { %1695 = vmatprep.subr.bf16.mxu1 %v2090_v52 }
 0x170   : > { %1696 = vmatpush3.bf16.msra.mxu1 %v2090_v52 }
 0x20b   : > { %v1683_v22 = vpop.f32.mrf.mxu0 }
 0x20c   : > { %v950_v24 = vmul.f32 %v1683_v22, %v2566_v20 }
 0x20d   : > { %v910_v25 = vpop.f32.mrf.mxu0 }
 0x20e   : > { %v965_v26 = vadd.f32 %v2571_v23, %v950_v24  ;;  %v948_v27 = vmul.f32 %v2566_v20, %v910_v25 }
 0x20f   : > { %v1684_v28 = vpop.f32.mrf.mxu0 }
 0x210   : > { %v973_v0 = vmax.f32 %v965_v26, 0.0  ;;  %v963_v29 = vadd.f32 %v2571_v23, %v948_v27  ;;  %v951_v30 = vmul.f32 %v1684_v28, %v2566_v20 }
 0x211   : > { %v913_v6 = vpop.f32.mrf.mxu0 }
 0x212   : > { %982 = vst.msk [vmem:[#allocation3 + $0x31] sm:$0xff] %vm328_vm3, %v973_v0  ;;  %v971_v57 = vmax.f32 %v963_v29, 0.0  ;;  %v966_v31 = vadd.f32 %v2571_v23, %v951_v30  ;;  %v949_v32 = vmul.f32 %v2566_v20, %v913_v6 }
 0x214   : > { %980 = vst.msk [vmem:[#allocation3 + $0x11] sm:$0xff] %vm328_vm3, %v971_v57  ;;  %v974_v33 = vmax.f32 %v966_v31, 0.0  ;;  %v964_v34 = vadd.f32 %v2571_v23, %v949_v32 }
 0x216   : > { %983 = vst.msk [vmem:[#allocation3 + $0x41] sm:$0xff] %vm328_vm3, %v974_v33  ;;  %v972_v35 = vmax.f32 %v964_v34, 0.0 }
 0x218   : > { %981 = vst.msk [vmem:[#allocation3 + $0x21] sm:$0xff] %vm328_vm3, %v972_v35 }
 0x219   : > { %v2585_v17 = vld [vmem:[#allocation3 + $0x30] sm:$0xff] }
 0x21a   : > { %v1023_v44 = vld [vmem:[#allocation3 + $0x31] sm:$0xff] }
 0x21b   : > { %v998_v37 = vld [vmem:[#allocation3 + $0x11] sm:$0xff] }
 0x21c   : > { %v1924_v38 = vpack.i.bf16 %v998_v37, %v997_v36  ;;  %v1006_v40 = vld [vmem:[#allocation3 + $0x12] sm:$0xff] }
 0x21d   : > { %v2587_v39 = vld [vmem:[#allocation3 + $0x40] sm:$0xff]  ;;  %v1929_v43 = vpack.i.bf16 %v1006_v40, %v1005_v21  ;;  %v2599_v47 = vld [vmem:[#allocation3 + $0x10] sm:$0xff] }
 0x21e   : > { %1925 = vrot.lane.b32.xlu0 %v1924_v38, %s2162_s16  ;;  %v1934_v41 = vpack.i.bf16 %v2587_v39, %v2585_v17  ;;  %v2592_v42 = vld [vmem:[#allocation3 + $0x41] sm:$0xff]  ;;  %v1031_v50 = vld [vmem:[#allocation3 + $0x32] sm:$0xff] }
 0x21f   : > { %v2595_v45 = vld [vmem:[#allocation3 + $0x20] sm:$0xff]  ;;  %v1939_v46 = vpack.i.bf16 %v2592_v42, %v1023_v44 }
 0x220   : > { %1935 = vrot.lane.b32.xlu1 %v1934_v41, %s2166_s15  ;;  %v2601_v48 = vld [vmem:[#allocation3 + $0x42] sm:$0xff]  ;;  %v1959_v49 = vpack.i.bf16 %v2595_v45, %v2599_v47  ;;  %v1974_v12 = vpack.i.bf16 %v2585_v17, %v2595_v45  ;;  %v1045_v41 = vld [vmem:[#allocation3 + $0x90] sm:$0xff] }
 0x221   : > { %v1022_v51 = vld [vmem:[#allocation3 + $0x21] sm:$0xff]  ;;  %v1944_v54 = vpack.i.bf16 %v2601_v48, %v1031_v50 }
 0x222   : > { %1930 = vrot.lane.b32.xlu0 %v1929_v43, %s2164_s30  ;;  %v1964_v58 = vpack.i.bf16 %v1022_v51, %v998_v37  ;;  %v1030_v60 = vld [vmem:[#allocation3 + $0x22] sm:$0xff]  ;;  %v1949_v62 = vpack.i.bf16 %v1023_v44, %v1022_v51 }
 0x223   : > { %v1969_v2 = vpack.i.bf16 %v1030_v60, %v1006_v40  ;;  %v1954_v8 = vpack.i.bf16 %v1031_v50, %v1030_v60 }
 0x224   : > { %1940 = vrot.lane.b32.xlu1 %v1939_v46, %s2168_s21  ;;  %v1053_v46 = vld [vmem:[#allocation3 + $0x91] sm:$0xff] }
 0x226   : > { %1960 = vrot.lane.b32.xlu0 %v1959_v49, %s2166_s15  ;;  %v1061_v49 = vld [vmem:[#allocation3 + $0x92] sm:$0xff] }
 0x228   : > { %1945 = vrot.lane.b32.xlu1 %v1944_v54, %s2169_s19 }
 0x22a   : > { %1965 = vrot.lane.b32.xlu0 %v1964_v58, %s2168_s21 }
 0x22b   : > { %v1687_v63 = vpop.f32.mrf.mxu0 }
 0x22c   : > { %v954_v1 = vmul.f32 %v1687_v63, %v2566_v20  ;;  %1950 = vrot.lane.b32.xlu1 %v1949_v62, %s2162_s16 }
 0x22d   : > { %v926_v3 = vpop.f32.mrf.mxu0 }
 0x22e   : > { %v969_v5 = vadd.f32 %v2571_v23, %v954_v1  ;;  %v952_v7 = vmul.f32 %v2566_v20, %v926_v3  ;;  %1970 = vrot.lane.b32.xlu0 %v1969_v2, %s2169_s19  ;;  %v989_v3 = vld [vmem:[#allocation3] sm:$0xff] }
 0x22f   : > { %v1688_v53 = vpop.f32.mrf.mxu0 }
 0x230   : > { %v977_v9 = vmax.f32 %v969_v5, 0.0  ;;  %v967_v10 = vadd.f32 %v2571_v23, %v952_v7  ;;  %v955_v11 = vmul.f32 %v1688_v53, %v2566_v20  ;;  %1955 = vrot.lane.b32.xlu1 %v1954_v8, %s2164_s30 }
 0x231   : > { %v929_v13 = vpop.f32.mrf.mxu0 }
 0x232   : > { %986 = vst.msk [vmem:[#allocation3 + $0x71] sm:$0xff] %vm328_vm3, %v977_v9  ;;  %v975_v14 = vmax.f32 %v967_v10, 0.0  ;;  %v970_v15 = vadd.f32 %v2571_v23, %v955_v11  ;;  %v953_v16 = vmul.f32 %v2566_v20, %v929_v13  ;;  %1975 = vrot.lane.b32.xlu0 %v1974_v12, %s2170_s13  ;;  %v2091_v20 = vld [vmem:[%s2812_s4] sm:$0xff]  }
 0x233   : > { %1697 = vmatprep.subr.bf16.mxu1 %v2091_v20 }
 0x234   : > { %984 = vst.msk [vmem:[#allocation3 + $0x51] sm:$0xff] %vm328_vm3, %v975_v14  ;;  %v978_v18 = vmax.f32 %v970_v15, 0.0  ;;  %v968_v56 = vadd.f32 %v2571_v23, %v953_v16  ;;  %1698 = vmatpush3.bf16.msra.mxu1 %v2091_v20 }
 0x236   : > { %987 = vst.msk [vmem:[#allocation3 + $0x81] sm:$0xff] %vm328_vm3, %v978_v18  ;;  %v976_v19 = vmax.f32 %v968_v56, 0.0  ;;  %1980 = vrot.lane.b32.xlu0 %v1949_v62, %s2171_s22 }
 0x238   : > { %985 = vst.msk [vmem:[#allocation3 + $0x61] sm:$0xff] %vm328_vm3, %v976_v19 }
 0x239   : > { %v2661_v6 = vld [vmem:[#allocation3 + $0x70] sm:$0xff] }
 0x23a   : > { %1985 = vrot.lane.b32.xlu0 %v1954_v8, %s2172_s27  ;;  %v1027_v34 = vld [vmem:[#allocation3 + $0x71] sm:$0xff] }
 0x23b   : > { %v1057_v22 = vld [vmem:[#allocation3 + $0x52] sm:$0xff] }
 0x23c   : > { %v2645_v23 = vld [vmem:[#allocation3 + $0x50] sm:$0xff]  ;;  %v2004_v24 = vpack.i.bf16 %v1057_v22, %v2601_v48 }
 0x23d   : > { %v1989_v25 = vpack.i.bf16 %v2645_v23, %v2587_v39  ;;  %v1049_v26 = vld [vmem:[#allocation3 + $0x51] sm:$0xff]  ;;  %v1020_v29 = vld [vmem:[#allocation3 + $0x80] sm:$0xff] }
 0x23e   : > { %2005 = vrot.lane.b32.xlu0 %v2004_v24, %s2172_s27  ;;  %v1994_v27 = vpack.i.bf16 %v1049_v26, %v2592_v42  ;;  %v2014_v57 = vpack.i.bf16 %v1020_v29, %v2661_v6  ;;  %v1028_v32 = vld [vmem:[#allocation3 + $0x81] sm:$0xff]  ;;  %v1035_v38 = vld [vmem:[#allocation3 + $0x72] sm:$0xff]  ;;  %v2029_v42 = vpack.i.bf16 %v1045_v41, %v1020_v29 }
 0x23f   : > { %1990 = vrot.lane.b32.xlu1 %v1989_v25, %s2170_s13  ;;  %v2653_v28 = vld [vmem:[#allocation3 + $0x60] sm:$0xff]  ;;  %v2019_v35 = vpack.i.bf16 %v1028_v32, %v1027_v34  ;;  %v2044_v48 = vpack.i.bf16 %v1053_v46, %v1028_v32 }
 0x240   : > { %v2049_v0 = vpack.i.bf16 %v2653_v28, %v2645_v23  ;;  %v1026_v30 = vld [vmem:[#allocation3 + $0x61] sm:$0xff]  ;;  %v2064_v40 = vpack.i.bf16 %v2661_v6, %v2653_v28 }
 0x241   : > { %v2054_v31 = vpack.i.bf16 %v1026_v30, %v1049_v26  ;;  %v1034_v33 = vld [vmem:[#allocation3 + $0x62] sm:$0xff]  ;;  %v2069_v43 = vpack.i.bf16 %v1027_v34, %v1026_v30 }
 0x242   : > { %2010 = vrot.lane.b32.xlu0 %v2004_v24, %s2164_s30  ;;  %v2059_v36 = vpack.i.bf16 %v1034_v33, %v1057_v22  ;;  %v1036_v37 = vld [vmem:[#allocation3 + $0x82] sm:$0xff]  ;;  %v2074_v44 = vpack.i.bf16 %v1035_v38, %v1034_v33 }
 0x243   : > { %1995 = vrot.lane.b32.xlu1 %v1994_v27, %s2171_s22  ;;  %v2024_v21 = vpack.i.bf16 %v1036_v37, %v1035_v38  ;;  %v2079_v50 = vpack.i.bf16 %v1061_v49, %v1036_v37 }
 0x246   : > { %2050 = vrot.lane.b32.xlu0 %v2049_v0, %s2166_s15 }
 0x247   : > { %2000 = vrot.lane.b32.xlu1 %v1994_v27, %s2162_s16 }
 0x24a   : > { %2055 = vrot.lane.b32.xlu0 %v2054_v31, %s2168_s21 }
 0x24b   : > { %2015 = vrot.lane.b32.xlu1 %v2014_v57, %s2166_s15 }
 0x24e   : > { %2060 = vrot.lane.b32.xlu0 %v2059_v36, %s2169_s19 }
 0x24f   : > { %2020 = vrot.lane.b32.xlu1 %v2019_v35, %s2168_s21 }
 0x252   : > { %2065 = vrot.lane.b32.xlu0 %v2064_v40, %s2170_s13 }
 0x253   : > { %2025 = vrot.lane.b32.xlu1 %v2024_v21, %s2169_s19 }
 0x256   : > { %2070 = vrot.lane.b32.xlu0 %v2069_v43, %s2171_s22 }
 0x257   : > { %2030 = vrot.lane.b32.xlu1 %v2029_v42, %s2170_s13 }
 0x25a   : > { %2075 = vrot.lane.b32.xlu0 %v2074_v44, %s2172_s27 }
 0x25b   : > { %2035 = vrot.lane.b32.xlu1 %v2069_v43, %s2162_s16 }
 0x25f   : > { %2040 = vrot.lane.b32.xlu1 %v2074_v44, %s2164_s30 }
 0x263   : > { %2045 = vrot.lane.b32.xlu1 %v2044_v48, %s2171_s22 }
 0x267   : > { %2080 = vrot.lane.b32.xlu1 %v2079_v50, %s2172_s27 }
 0x290   : > { %v1926_v51 = vpop.permute.xlu0 %1925 }
 0x291   : > { %v1928_v1 = vunpack.i.h.bf16 %v1926_v51  ;;  %v1927_v2 = vunpack.i.l.bf16 %v1926_v51 }
 0x292   : > { %v1936_v54 = vpop.permute.xlu1 %1935 }
 0x293   : > { %v1318_v5 = vsel %vm328_vm3, %v989_v3, %v1927_v2  ;;  %v1319_v7 = vsel %vm328_vm3, %v2599_v47, %v1928_v1  ;;  %v1938_v10 = vunpack.i.h.bf16 %v1936_v54  ;;  %v1937_v11 = vunpack.i.l.bf16 %v1936_v54 }
 0x294   : > { %v1931_v55 = vpop.permute.xlu0 %1930 }
 0x295   : > { %v1933_v8 = vunpack.i.h.bf16 %v1931_v55  ;;  %v1932_v53 = vunpack.i.l.bf16 %v1931_v55 }
 0x296   : > { %v2679_v58 = vpop.permute.xlu1 %1940 }
 0x297   : > { %v1326_v24 = vsel %vm790_vm6, %v1318_v5, %v1932_v53  ;;  %v1327_v47 = vsel %vm790_vm6, %v1319_v7, %v1933_v8  ;;  %v1943_v49 = vunpack.i.h.bf16 %v2679_v58  ;;  %v1942_v50 = vunpack.i.l.bf16 %v2679_v58 }
 0x298   : > { %v1961_v59 = vpop.permute.xlu0 %1960 }
 0x299   : > { %v1963_v12 = vunpack.i.h.bf16 %v1961_v59  ;;  %v1962_v13 = vunpack.i.l.bf16 %v1961_v59 }
 0x29a   : > { %v2681_v60 = vpop.permute.xlu1 %1945 }
 0x29b   : > { %v1335_v27 = vsel %vm808_vm8, %v1327_v47, %v1963_v12  ;;  %v1334_v0 = vsel %vm808_vm8, %v1326_v24, %v1962_v13  ;;  %v1948_v1 = vunpack.i.h.bf16 %v2681_v60  ;;  %v1947_v2 = vunpack.i.l.bf16 %v2681_v60 }
 0x29c   : > { %v1966_v61 = vpop.permute.xlu0 %1965 }
 0x29d   : > { %v1968_v14 = vunpack.i.h.bf16 %v1966_v61  ;;  %v1967_v15 = vunpack.i.l.bf16 %v1966_v61 }
 0x29e   : > { %v1951_v62 = vpop.permute.xlu1 %1950 }
 0x29f   : > { %v1953_v16 = vunpack.i.h.bf16 %v1951_v62  ;;  %v1952_v52 = vunpack.i.l.bf16 %v1951_v62  ;;  %v1342_v57 = vsel %vm826_vm10, %v1334_v0, %v1967_v15  ;;  %v1343_v31 = vsel %vm826_vm10, %v1335_v27, %v1968_v14 }
 0x2a0   : > { %v1971_v63 = vpop.permute.xlu0 %1970 }
 0x2a1   : > { %v1973_v18 = vunpack.i.h.bf16 %v1971_v63  ;;  %v1972_v56 = vunpack.i.l.bf16 %v1971_v63  ;;  %v1321_v32 = vsel %vm328_vm3, %v2585_v17, %v1953_v16  ;;  %v1320_v33 = vsel %vm328_vm3, %v2595_v45, %v1952_v52 }
 0x2a2   : > { %v1956_v9 = vpop.permute.xlu1 %1955 }
 0x2a3   : > { %v1958_v19 = vunpack.i.h.bf16 %v1956_v9  ;;  %v1957_v20 = vunpack.i.l.bf16 %v1956_v9  ;;  %v1351_v34 = vsel %vm1350_vm15, %v1342_v57, %v1972_v56  ;;  %v1352_v35 = vsel %vm1350_vm15, %v1343_v31, %v1973_v18 }
 0x2a4   : > { %v1976_v4 = vpop.permute.xlu0 %1975 }
 0x2a5   : > { %v1978_v25 = vunpack.i.h.bf16 %v1976_v4  ;;  %v1977_v26 = vunpack.i.l.bf16 %v1976_v4  ;;  %v1328_v36 = vsel %vm790_vm6, %v1320_v33, %v1957_v20  ;;  %v1329_v37 = vsel %vm790_vm6, %v1321_v32, %v1958_v19 }
 0x2a6   : > { %v1336_v45 = vsel %vm808_vm8, %v1328_v36, %v1937_v11  ;;  %v1337_v44 = vsel %vm808_vm8, %v1329_v37, %v1938_v10 }
 0x2a7   : > { %v1360_v21 = vsel %vm1359_vm0, %v1351_v34, %v1977_v26  ;;  %v1361_v40 = vsel %vm1359_vm0, %v1352_v35, %v1978_v25  ;;  %v1344_v59 = vsel %vm826_vm10, %v1336_v45, %v1942_v50  ;;  %v1345_v61 = vsel %vm826_vm10, %v1337_v44, %v1943_v49 }
 0x2a8   : > { %v1981_v22 = vpop.permute.xlu0 %1980  ;;  %v1353_v5 = vsel %vm1350_vm15, %v1344_v59, %v1947_v2  ;;  %v1354_v58 = vsel %vm1350_vm15, %v1345_v61, %v1948_v1 }
 0x2a9   : > { %v1983_v29 = vunpack.i.h.bf16 %v1981_v22  ;;  %v1982_v30 = vunpack.i.l.bf16 %v1981_v22 }
 0x2ab   : > { %v1369_v17 = vsel %vm1368_vm1, %v1360_v21, %v1982_v30  ;;  %v1370_v43 = vsel %vm1368_vm1, %v1361_v40, %v1983_v29 }
 0x2ac   : > { %v1986_v38 = vpop.permute.xlu0 %1985 }
 0x2ad   : > { %v1988_v41 = vunpack.i.h.bf16 %v1986_v38  ;;  %v1987_v42 = vunpack.i.l.bf16 %v1986_v38 }
 0x2af   : > { %v1378_v46 = vsel %vm1377_vm2, %v1369_v17, %v1987_v42  ;;  %v1379_v48 = vsel %vm1377_vm2, %v1370_v43, %v1988_v41 }
 0x2b0   : > { %v2006_v51 = vpop.permute.xlu0 %2005  ;;  %v1386_v55 = vpack.c.bf16 %v1379_v48, %v1378_v46 }
 0x2b1   : > { %v1991_v54 = vpop.permute.xlu1 %1990  ;;  %v2008_v53 = vunpack.i.h.bf16 %v2006_v51  ;;  %v2007_v9 = vunpack.i.l.bf16 %v2006_v51 }
 0x2b2   : > { %v1993_v62 = vunpack.i.h.bf16 %v1991_v54  ;;  %v1992_v63 = vunpack.i.l.bf16 %v1991_v54  ;;  %1699 = vmatprep.mubr.msk.bf16.mxu1 %vm1426_vm4, %v1386_v55 }
 0x2b4   : > { %v2011_v4 = vpop.permute.xlu0 %2010  ;;  %v1363_v10 = vsel %vm1359_vm0, %v1354_v58, %v1993_v62  ;;  %v1362_v11 = vsel %vm1359_vm0, %v1353_v5, %v1992_v63 }
 0x2b5   : > { %v1996_v3 = vpop.permute.xlu1 %1995  ;;  %v2013_v26 = vunpack.i.h.bf16 %v2011_v4  ;;  %v2012_v27 = vunpack.i.l.bf16 %v2011_v4 }
 0x2b6   : > { %v1998_v7 = vunpack.i.h.bf16 %v1996_v3  ;;  %v1997_v8 = vunpack.i.l.bf16 %v1996_v3 }
 0x2b8   : > { %v1371_v12 = vsel %vm1368_vm1, %v1362_v11, %v1997_v8  ;;  %v1372_v13 = vsel %vm1368_vm1, %v1363_v10, %v1998_v7  ;;  %v2051_v60 = vpop.permute.xlu0 %2050 }
 0x2b9   : > { %v2001_v14 = vpop.permute.xlu1 %2000  ;;  %v1380_v15 = vsel %vm1377_vm2, %v1371_v12, %v2007_v9  ;;  %v1381_v16 = vsel %vm1377_vm2, %v1372_v13, %v2008_v53  ;;  %v2053_v31 = vunpack.i.h.bf16 %v2051_v60  ;;  %v2052_v32 = vunpack.i.l.bf16 %v2051_v60 }
 0x2ba   : > { %v1387_v52 = vpack.c.bf16 %v1381_v16, %v1380_v15  ;;  %v2003_v19 = vunpack.i.h.bf16 %v2001_v14  ;;  %v2002_v20 = vunpack.i.l.bf16 %v2001_v14 }
 0x2bc   : > { %1700 = vmatmul.mubr.msk.bf16.vlgmr.msra.gmra.mxu1 %vm1426_vm4, %v1387_v52  ;;  %v2056_v56 = vpop.permute.xlu0 %2055  ;;  %v1322_v47 = vsel %vm328_vm3, %v2587_v39, %v2002_v20  ;;  %v1323_v25 = vsel %vm328_vm3, %v2645_v23, %v2003_v19 }
 0x2bd   : > { %v2016_v18 = vpop.permute.xlu1 %2015  ;;  %v1330_v30 = vsel %vm790_vm6, %v1322_v47, %v2012_v27  ;;  %v1331_v57 = vsel %vm790_vm6, %v1323_v25, %v2013_v26  ;;  %v2058_v33 = vunpack.i.h.bf16 %v2056_v56  ;;  %v2057_v34 = vunpack.i.l.bf16 %v2056_v56 }
 0x2be   : > { %v1339_v35 = vsel %vm808_vm8, %v1331_v57, %v2053_v31  ;;  %v1338_v36 = vsel %vm808_vm8, %v1330_v30, %v2052_v32  ;;  %v2018_v58 = vunpack.i.h.bf16 %v2016_v18  ;;  %v2017_v7 = vunpack.i.l.bf16 %v2016_v18  ;;  %v1653_v32 = vld [vmem:[%s2813_s5] ss:$0 sm:$0xff] }
 0x2bf   : > { %v1346_v17 = vsel %vm826_vm10, %v1338_v36, %v2057_v34  ;;  %v1347_v43 = vsel %vm826_vm10, %v1339_v35, %v2058_v33  ;;  %v1654_v34 = vld [vmem:[%s2814_s6] ss:$0 sm:$0xff] }
 0x2c0   : > { %v2061_v24 = vpop.permute.xlu0 %2060 }
 0x2c1   : > { %v2724_v22 = vpop.permute.xlu1 %2020  ;;  %v2063_v39 = vunpack.i.h.bf16 %v2061_v24  ;;  %v2062_v37 = vunpack.i.l.bf16 %v2061_v24 }
 0x2c2   : > { %v2023_v9 = vunpack.i.h.bf16 %v2724_v22  ;;  %v2022_v10 = vunpack.i.l.bf16 %v2724_v22 }
 0x2c3   : > { %v1355_v45 = vsel %vm1350_vm15, %v1346_v17, %v2062_v37  ;;  %v1356_v44 = vsel %vm1350_vm15, %v1347_v43, %v2063_v39 }
 0x2c4   : > { %v2066_v29 = vpop.permute.xlu0 %2065 }
 0x2c5   : > { %v2026_v0 = vpop.permute.xlu1 %2025  ;;  %v2068_v21 = vunpack.i.h.bf16 %v2066_v29  ;;  %v2067_v40 = vunpack.i.l.bf16 %v2066_v29 }
 0x2c6   : > { %v2028_v13 = vunpack.i.h.bf16 %v2026_v0  ;;  %v2027_v14 = vunpack.i.l.bf16 %v2026_v0 }
 0x2c7   : > { %v1364_v49 = vsel %vm1359_vm0, %v1355_v45, %v2067_v40  ;;  %v1365_v50 = vsel %vm1359_vm0, %v1356_v44, %v2068_v21 }
 0x2c8   : > { %v2071_v23 = vpop.permute.xlu0 %2070 }
 0x2c9   : > { %v2031_v38 = vpop.permute.xlu1 %2030  ;;  %v2073_v41 = vunpack.i.h.bf16 %v2071_v23  ;;  %v2072_v42 = vunpack.i.l.bf16 %v2071_v23 }
 0x2ca   : > { %v2033_v16 = vunpack.i.h.bf16 %v2031_v38  ;;  %v2032_v52 = vunpack.i.l.bf16 %v2031_v38 }
 0x2cb   : > { %v1373_v55 = vsel %vm1368_vm1, %v1364_v49, %v2072_v42  ;;  %v1374_v59 = vsel %vm1368_vm1, %v1365_v50, %v2073_v41 }
 0x2cc   : > { %v2076_v46 = vpop.permute.xlu0 %2075 }
 0x2cd   : > { %v2036_v48 = vpop.permute.xlu1 %2035  ;;  %v2078_v51 = vunpack.i.h.bf16 %v2076_v46  ;;  %v2077_v54 = vunpack.i.l.bf16 %v2076_v46 }
 0x2ce   : > { %v2038_v61 = vunpack.i.h.bf16 %v2036_v48  ;;  %v2037_v62 = vunpack.i.l.bf16 %v2036_v48 }
 0x2cf   : > { %v1382_v63 = vsel %vm1377_vm2, %v1373_v55, %v2077_v54  ;;  %v1383_v1 = vsel %vm1377_vm2, %v1374_v59, %v2078_v51 }
 0x2d0   : > { %v1388_v2 = vpack.c.bf16 %v1383_v1, %v1382_v63  ;;  %v1325_v8 = vsel %vm328_vm3, %v2661_v6, %v2038_v61  ;;  %v1324_v53 = vsel %vm328_vm3, %v2653_v28, %v2037_v62 }
 0x2d1   : > { %v2041_v3 = vpop.permute.xlu1 %2040 }
 0x2d2   : > { %v2043_v4 = vunpack.i.h.bf16 %v2041_v3  ;;  %v2042_v5 = vunpack.i.l.bf16 %v2041_v3  ;;  %1703 = vmatprep.mubr.msk.bf16.mxu1 %vm1426_vm4, %v1388_v2 }
 0x2d4   : > { %v1332_v11 = vsel %vm790_vm6, %v1324_v53, %v2042_v5  ;;  %v1333_v12 = vsel %vm790_vm6, %v1325_v8, %v2043_v4 }
 0x2d5   : > { %v1340_v60 = vsel %vm808_vm8, %v1332_v11, %v2017_v7  ;;  %v1341_v15 = vsel %vm808_vm8, %v1333_v12, %v2018_v58  ;;  %v2046_v6 = vpop.permute.xlu1 %2045 }
 0x2d6   : > { %v1348_v28 = vsel %vm826_vm10, %v1340_v60, %v2022_v10  ;;  %v1349_v18 = vsel %vm826_vm10, %v1341_v15, %v2023_v9  ;;  %v2048_v56 = vunpack.i.h.bf16 %v2046_v6  ;;  %v2047_v19 = vunpack.i.l.bf16 %v2046_v6 }
 0x2d7   : > { %v1357_v20 = vsel %vm1350_vm15, %v1348_v28, %v2027_v14  ;;  %v1358_v22 = vsel %vm1350_vm15, %v1349_v18, %v2028_v13 }
 0x2d8   : > { %v1366_v24 = vsel %vm1359_vm0, %v1357_v20, %v2032_v52  ;;  %v1367_v47 = vsel %vm1359_vm0, %v1358_v22, %v2033_v16 }
 0x2d9   : > { %v2081_v25 = vpop.permute.xlu1 %2080  ;;  %v1375_v0 = vsel %vm1368_vm1, %v1366_v24, %v2047_v19  ;;  %v1376_v29 = vsel %vm1368_vm1, %v1367_v47, %v2048_v56 }
 0x2da   : > { %v2083_v26 = vunpack.i.h.bf16 %v2081_v25  ;;  %v2082_v27 = vunpack.i.l.bf16 %v2081_v25 }
 0x2dc   : > { %v1384_v30 = vsel %vm1377_vm2, %v1375_v0, %v2082_v27  ;;  %v1385_v57 = vsel %vm1377_vm2, %v1376_v29, %v2083_v26 }
 0x2dd   : > { %v1389_v31 = vpack.c.bf16 %v1385_v57, %v1384_v30 }
 0x2df   : > { %1704 = vmatmul.mubr.msk.bf16.gmra.mxu1 %vm1426_vm4, %v1389_v31 }
 0x37c   : > { %v1701_v33 = vpop.f32.mrf.mxu1 }
 0x37d   : > { %v1517_v35 = vmul.f32 %v1701_v33, %v1653_v32 }
 0x37e   : > { %v1477_v36 = vpop.f32.mrf.mxu1 }
 0x37f   : > { %v1532_v39 = vadd.f32 %v1654_v34, %v1517_v35  ;;  %v1515_v37 = vmul.f32 %v1653_v32, %v1477_v36 }
 0x380   : > { %v1702_v38 = vpop.f32.mrf.mxu1 }
 0x381   : > { %v1540_v23 = vmax.f32 %v1532_v39, 0.0  ;;  %v1530_v21 = vadd.f32 %v1654_v34, %v1515_v37  ;;  %v1518_v40 = vmul.f32 %v1702_v38, %v1653_v32 }
 0x382   : > { %v1480_v41 = vpop.f32.mrf.mxu1 }
 0x383   : > { %1548 = vst.msk [vmem:[%s2777_s20 + $0x10] sm:$0xff] %vm328_vm3, %v1540_v23  ;;  %v1538_v42 = vmax.f32 %v1530_v21, 0.0  ;;  %v1533_v17 = vadd.f32 %v1654_v34, %v1518_v40  ;;  %v1516_v43 = vmul.f32 %v1653_v32, %v1480_v41 }
 0x385   : > { %1546 = vst.msk [vmem:[%s2777_s20] sm:$0xff] %vm328_vm3, %v1538_v42  ;;  %v1541_v45 = vmax.f32 %v1533_v17, 0.0  ;;  %v1531_v44 = vadd.f32 %v1654_v34, %v1516_v43 }
 0x387   : > { %1549 = vst.msk [vmem:[%s2777_s20 + $0x18] sm:$0xff] %vm328_vm3, %v1541_v45  ;;  %v1539_v46 = vmax.f32 %v1531_v44, 0.0 }
 0x389   : > { %1547 = vst.msk [vmem:[%s2777_s20 + $0x8] sm:$0xff] %vm328_vm3, %v1539_v46 }
 0x39f   : > { %v1705_v48 = vpop.f32.mrf.mxu1 }
 0x3a0   : > { %v1521_v49 = vmul.f32 %v1705_v48, %v1653_v32 }
 0x3a1   : > { %v1493_v50 = vpop.f32.mrf.mxu1 }
 0x3a2   : > { %v1536_v51 = vadd.f32 %v1654_v34, %v1521_v49  ;;  %v1519_v54 = vmul.f32 %v1653_v32, %v1493_v50 }
 0x3a3   : > { %v1706_v55 = vpop.f32.mrf.mxu1 }
 0x3a4   : > { %v1544_v59 = vmax.f32 %v1536_v51, 0.0  ;;  %v1534_v61 = vadd.f32 %v1654_v34, %v1519_v54  ;;  %v1522_v62 = vmul.f32 %v1706_v55, %v1653_v32 }
 0x3a5   : > { %v1496_v63 = vpop.f32.mrf.mxu1 }
 0x3a6   : > { %1552 = vst.msk [vmem:[%s2777_s20 + $0x30] sm:$0xff] %vm328_vm3, %v1544_v59  ;;  %v1542_v1 = vmax.f32 %v1534_v61, 0.0  ;;  %v1537_v2 = vadd.f32 %v1654_v34, %v1522_v62  ;;  %v1520_v3 = vmul.f32 %v1653_v32, %v1496_v63 }
 0x3a8   : > { %1550 = vst.msk [vmem:[%s2777_s20 + $0x20] sm:$0xff] %vm328_vm3, %v1542_v1  ;;  %v1545_v4 = vmax.f32 %v1537_v2, 0.0  ;;  %v1535_v5 = vadd.f32 %v1654_v34, %v1520_v3 }
 0x3aa   : > { %1553 = vst.msk [vmem:[%s2777_s20 + $0x38] sm:$0xff] %vm328_vm3, %v1545_v4  ;;  %v1543_v58 = vmax.f32 %v1535_v5, 0.0 }
 0x3ac   : > { %1551 = vst.msk [vmem:[%s2777_s20 + $0x28] sm:$0xff] %vm328_vm3, %v1543_v58 }
 0x3ad PF: > { %p17_p9 = scmp.ge.s32.totalorder %s2235_s29, 4   ;;  %s2821_s24 = smov %s2146_s25 }
 0x3ae   : > { %s2822_s25 = smov %s2150_s26  ;;  %s2823_s26 = smov %s2245_s9 }
 0x3af   : > { %s2824_s27 = smov %s2235_s29  ;;  %19 = sbr.rel (!%p17_p9) target bundleno = 3 (0x3), region = 97 }
 0x3b4   :  { %1575 = vsyncpa [#allocation5], 1 }
 0x3b5   :  { %1577 = vsyncpa [#allocation5 + $0x1], 1 }

</bundles_post_ra>
